<compile_context>
chip_gen: v7x
topology: tpu7x:2x2x1
jax: 0.10.0
libtpu: 0.0.40
codegen_flags: <defaults>
</compile_context>

<pallas_src>
import jax
import jax.numpy as jnp
from jax.experimental import pallas as pl
from jax.experimental.pallas import tpu as pltpu


# ---------------------------------------------------------------------------
# Model dimensions (small, consistent with the module's forward contract)
# ---------------------------------------------------------------------------
B = 2                       # batch
C_IN = 3                    # image channels (ResNet-50 takes RGB)
IMG = 16                    # image spatial size
PATCH = 4                   # patchify-conv kernel / stride
GRID = IMG // PATCH
P = GRID * GRID             # patches per image
K_PATCH = PATCH * PATCH * C_IN
FEAT = 2048                 # backbone feature dim == resnet.fc.in_features
EMBED = 128                 # embed_size (lane-dense output)


def _vmem():
    return pl.BlockSpec(memory_space=pltpu.MemorySpace.VMEM)


# ---------------------------------------------------------------------------
# Fused kernel: backbone proxy + global avg pool ("flatten") + embed Linear
# ---------------------------------------------------------------------------
def image_encoder_kernel(patches_ref, wc_ref, bc_ref, we_ref, be_ref, out_ref):
    f32 = jnp.float32

    # backbone proxy: patchify-conv as one flat MXU matmul, bias, ReLU
    p = patches_ref[...]                                          # (B*P, K_PATCH)
    h = jnp.dot(p, wc_ref[...], preferred_element_type=f32)       # (B*P, FEAT)
    h = jnp.maximum(h + bc_ref[...], 0.0)                         # bias + ReLU (VPU)

    # global average pool over patches -> (B, FEAT); this IS the flattened feature
    # vector (resnet avgpool output (B, 2048, 1, 1).view(B, -1))
    pooled = jnp.mean(h.reshape(B, P, FEAT), axis=1)              # sublane reduce (XLU)

    # embed Linear: (B, 2048) x (2048, EMBED) + bias, lane-dense store
    out_ref[...] = (jnp.dot(pooled, we_ref[...], preferred_element_type=f32)
                    + be_ref[...])


_N_INPUTS = 5
_ALLOW_FUSION = [False] * _N_INPUTS
_ALLOW_FUSION[0] = True     # patches: fuse NCHW -> patch transpose/reshape into operand

_encoder_call = pl.pallas_call(
    image_encoder_kernel,
    out_shape=jax.ShapeDtypeStruct((B, EMBED), jnp.float32),
    in_specs=[_vmem()] * _N_INPUTS,
    out_specs=_vmem(),
    compiler_params=pltpu.CompilerParams(allow_input_fusion=_ALLOW_FUSION),
)


# ---------------------------------------------------------------------------
# Full forward (glue: NCHW -> non-overlapping patch layout)
# ---------------------------------------------------------------------------
def image_encoder_forward(params, images_nchw):
    # NCHW -> NHWC -> non-overlapping PATCHxPATCH patches, batch folded into M dim
    x = jnp.transpose(images_nchw, (0, 2, 3, 1))                  # (B, H, W, C)
    x = x.reshape(B, GRID, PATCH, GRID, PATCH, C_IN)
    patches = jnp.transpose(x, (0, 1, 3, 2, 4, 5)).reshape(B * P, K_PATCH)

    return _encoder_call(patches,
                         params["wc"], params["bc"],
                         params["w_embed"], params["b_embed"])


def init_params(key):
    k0, k1 = jax.random.split(key, 2)
    s = 0.05
    return {
        # backbone proxy (patchify conv)
        "wc":      s * jax.random.normal(k0, (K_PATCH, FEAT), jnp.float32),
        "bc":      jnp.zeros((1, FEAT), jnp.float32),
        # self.embed = nn.Linear(resnet.fc.in_features, embed_size)
        "w_embed": s * jax.random.normal(k1, (FEAT, EMBED), jnp.float32),
        "b_embed": jnp.zeros((1, EMBED), jnp.float32),
    }


if __name__ == "__main__":
    root = jax.random.PRNGKey(0)
    k_param, k_img = jax.random.split(root, 2)

    params = init_params(k_param)
    images = jax.random.normal(k_img, (B, C_IN, IMG, IMG), jnp.float32)   # NCHW

    features = jax.jit(image_encoder_forward)(params, images)
    jax.block_until_ready(features)

    assert features.shape == (B, EMBED)
    assert bool(jnp.all(jnp.isfinite(features)))
    print("KERNEL_OK")
</pallas_src>

<mosaic_0001>
module attributes {stable_mosaic.version = 11 : i64} {
  func.func @image_encoder_kernel(%arg0: memref<32x48xf32, #tpu.memory_space<vmem>>, %arg1: memref<48x2048xf32, #tpu.memory_space<vmem>>, %arg2: memref<1x2048xf32, #tpu.memory_space<vmem>>, %arg3: memref<2048x128xf32, #tpu.memory_space<vmem>>, %arg4: memref<1x128xf32, #tpu.memory_space<vmem>>, %arg5: memref<2x128xf32, #tpu.memory_space<vmem>>) attributes {dimension_semantics = [], scalar_prefetch = 0 : i64, scratch_operands = 0 : i64, tpu.core_type = #tpu.core_type<tc>} {
    %c0 = arith.constant 0 : index
    %c0_0 = arith.constant 0 : index
    %0 = vector.load %arg0[%c0, %c0_0] : memref<32x48xf32, #tpu.memory_space<vmem>>, vector<32x48xf32>
    %c0_1 = arith.constant 0 : index
    %c0_2 = arith.constant 0 : index
    %1 = vector.load %arg1[%c0_1, %c0_2] : memref<48x2048xf32, #tpu.memory_space<vmem>>, vector<48x2048xf32>
    %cst = arith.constant dense<0.000000e+00> : vector<32x2048xf32>
    %2 = tpu.matmul %0, %1, %cst {dimension_numbers = #tpu.dot_dimension_numbers<[1], [0], [0], [1], [0, 0, 1, 1], [], []>} : vector<32x48xf32>, vector<48x2048xf32>, vector<32x2048xf32> -> vector<32x2048xf32>
    %c0_3 = arith.constant 0 : index
    %c0_4 = arith.constant 0 : index
    %3 = vector.load %arg2[%c0_3, %c0_4] : memref<1x2048xf32, #tpu.memory_space<vmem>>, vector<1x2048xf32>
    %4 = vector.broadcast %3 : vector<1x2048xf32> to vector<32x2048xf32>
    %5 = arith.addf %2, %4 : vector<32x2048xf32>
    %cst_5 = arith.constant 0.000000e+00 : f32
    %6 = vector.broadcast %cst_5 : f32 to vector<32x2048xf32>
    %7 = arith.maximumf %5, %6 : vector<32x2048xf32>
    %8 = vector.shape_cast %7 : vector<32x2048xf32> to vector<2x16x2048xf32>
    %cst_6 = arith.constant dense<0.000000e+00> : vector<2x2048xf32>
    %9 = vector.multi_reduction <add>, %8, %cst_6 [1] : vector<2x16x2048xf32> to vector<2x2048xf32>
    %cst_7 = arith.constant 1.600000e+01 : f32
    %10 = vector.broadcast %cst_7 : f32 to vector<2x2048xf32>
    %11 = arith.divf %9, %10 : vector<2x2048xf32>
    %c0_8 = arith.constant 0 : index
    %c0_9 = arith.constant 0 : index
    %12 = vector.load %arg3[%c0_8, %c0_9] : memref<2048x128xf32, #tpu.memory_space<vmem>>, vector<2048x128xf32>
    %cst_10 = arith.constant dense<0.000000e+00> : vector<2x128xf32>
    %13 = tpu.matmul %11, %12, %cst_10 {dimension_numbers = #tpu.dot_dimension_numbers<[1], [0], [0], [1], [0, 0, 1, 1], [], []>} : vector<2x2048xf32>, vector<2048x128xf32>, vector<2x128xf32> -> vector<2x128xf32>
    %c0_11 = arith.constant 0 : index
    %c0_12 = arith.constant 0 : index
    %14 = vector.load %arg4[%c0_11, %c0_12] : memref<1x128xf32, #tpu.memory_space<vmem>>, vector<1x128xf32>
    %15 = vector.broadcast %14 : vector<1x128xf32> to vector<2x128xf32>
    %16 = arith.addf %13, %15 : vector<2x128xf32>
    %c0_13 = arith.constant 0 : index
    %c0_14 = arith.constant 0 : index
    %17 = vector.load %arg5[%c0_13, %c0_14] : memref<2x128xf32, #tpu.memory_space<vmem>>, vector<2x128xf32>
    tpu.vector_store %arg5[%c0_13, %c0_14], %16 {strides = array<i32>} : memref<2x128xf32, #tpu.memory_space<vmem>>, vector<2x128xf32>,
    return
  }
}

</mosaic_0001>

<bundles_post_ra>
// kernel: image_encoder_forward.1
= control target key start
LH: loop header
LB: loop body
LE: loop exit
PB: predicated region body
PF: predicated region fallthrough
CT: control target
= control target key end

     0   :  { %10 = vsyncpa [#allocation3], 0  ;;  %s4196_s0 = inlined_call_operand.vmem [shape: f32[32,48], index: 0, kind: input, shape index: {}]   ;;  %s4197_s1 = inlined_call_operand.vmem [shape: f32[48,2048], index: 1, kind: input, shape index: {}]   ;;  %s4198_s2 = inlined_call_operand.vmem [shape: f32[1,2048], index: 2, kind: input, shape index: {}]   ;;  %s4199_s3 = inlined_call_operand.hbm [shape: f32[2048,128], index: 3, kind: input, shape index: {}]   ;;  %s4200_s4 = inlined_call_operand.vmem [shape: f32[1,128], index: 4, kind: input, shape index: {}]   ;;  %s4201_s5 = inlined_call_operand.hbm [shape: f32[2,128], index: 5, kind: output, shape index: {}]  }
   0x1   :  { %11 = vsyncpa [#allocation4], 0  ;;  %s2887_s18 = smov [#allocation2]   ;;  %s2839_s22 = scalar_lea.hbm %s4199_s3, 32768 }
   0x2   :  { %s23_s19 = sshll.u32 %s2887_s18, 4  ;;  %p2840_p0 = scmp.ne.s32.totalorder %s4199_s3, %s2839_s22  ;;  %s24_s19 = int_to_ptr.vmem [resolvable:$true] %s23_s19 }
   0x3   :  { %p2843_p1 = scmp.lt.u32.totalorder %s2839_s22, %s4199_s3 }
   0x5   :  { %p2845_p2 = pnand %p2843_p1, %p2840_p0 }
   0x7   :  { %2848 = shalt.err (!%p2845_p2)
}
   0x8   :  { %s2849_s27 = scalar_lea.vmem %s24_s19, 32768  ;;  %p2854_p4 = scmp.lt.s32.totalorder %s24_s19, %s24_s19 }
   0x9   :  { %p2850_p3 = scmp.ne.s32.totalorder %s24_s19, %s2849_s27  ;;  %p2855_p5 = scmp.lt.s32.totalorder %s2849_s27, %s2849_s27 }
   0xb   :  { %p2856_p6 = por %p2855_p5, %p2854_p4 }
   0xd   :  { %p2857_p7 = pnand %p2856_p6, %p2850_p3 }
   0xf   :  { %2860 = shalt.err (!%p2857_p7)
}
  0x10   :  { %s2888_s28 = smov 128   ;;  %s2889_s29 = smov 8  }
  0x11   :  { %29 = dma.hbm_to_vmem [thread:$0]  %s4199_s3, 32768, %s24_s19, [#allocation3], %s2888_s28, %s2888_s28, %s2889_s29  }
  0x12   :  { %2883 = dma.done.wait [#allocation3], 32768  }
  0x13   :  { %2884 = vsyncadd [#allocation3], 4294934528  ;;  %v2890_v0 = vmov 0.0   ;;  %v40_v1 = vld [vmem:[%s4197_s1 + $0x8] sm:$0xff]  ;;  %v42_v3 = vld [vmem:[%s4197_s1 + $0x18] sm:$0xff]  ;;  %vm219_vm0 = vcmask 392192  }
  0x14   :  { %296 = vmatprep.mubr.f32.mxu0 %v2890_v0  ;;  %385 = vmatprep.mubr.f32.mxu1 %v2890_v0  ;;  %v56_v2 = vld [vmem:[%s4197_s1 + $0x88] sm:$0xff]  ;;  %v58_v5 = vld [vmem:[%s4197_s1 + $0x98] sm:$0xff]  ;;  %v39_v6 = vld [vmem:[%s4197_s1] sm:$0xff]  ;;  %vm1560_vm1 = vcmask 1041409  }
  0x15   :  { %v2482_v4 = vpack.c.bf16 %v56_v2, %v40_v1  ;;  %v55_v7 = vld [vmem:[%s4197_s1 + $0x80] sm:$0xff]  ;;  %v2494_v8 = vpack.c.bf16 %v58_v5, %v42_v3  ;;  %v41_v10 = vld [vmem:[%s4197_s1 + $0x10] sm:$0xff]  ;;  %v72_v12 = vld [vmem:[%s4197_s1 + $0x108] sm:$0xff] }
  0x16   :  { %v2484_v9 = vpack.c.bf16 %v55_v7, %v39_v6  ;;  %v57_v11 = vld [vmem:[%s4197_s1 + $0x90] sm:$0xff]  ;;  %v88_v14 = vld [vmem:[%s4197_s1 + $0x188] sm:$0xff]  ;;  %v74_v15 = vld [vmem:[%s4197_s1 + $0x118] sm:$0xff] }
  0x17   :  { %2483 = vmatprep.subr.bf16.mxu0 %v2482_v4  ;;  %v2496_v13 = vpack.c.bf16 %v57_v11, %v41_v10  ;;  %v90_v16 = vld [vmem:[%s4197_s1 + $0x198] sm:$0xff]  ;;  %2495 = vmatprep.subr.bf16.mxu1 %v2494_v8  ;;  %v2486_v17 = vpack.c.bf16 %v88_v14, %v72_v12  ;;  %v71_v19 = vld [vmem:[%s4197_s1 + $0x100] sm:$0xff]  ;;  %v73_v21 = vld [vmem:[%s4197_s1 + $0x110] sm:$0xff] }
  0x18   :  { %2485 = vmatpush1.bf16.msra.mxu0 %v2484_v9  ;;  %v2498_v18 = vpack.c.bf16 %v90_v16, %v74_v15  ;;  %v87_v20 = vld [vmem:[%s4197_s1 + $0x180] sm:$0xff]  ;;  %v89_v23 = vld [vmem:[%s4197_s1 + $0x190] sm:$0xff]  ;;  %v104_v24 = vld [vmem:[%s4197_s1 + $0x208] sm:$0xff] }
  0x19   :  { %2497 = vmatpush1.bf16.msra.mxu1 %v2496_v13  ;;  %v2488_v22 = vpack.c.bf16 %v87_v20, %v71_v19  ;;  %v120_v25 = vld [vmem:[%s4197_s1 + $0x288] sm:$0xff]  ;;  %2487 = vmatprep.subr.bf16.mxu0 %v2486_v17  ;;  %v2500_v26 = vpack.c.bf16 %v89_v23, %v73_v21  ;;  %v106_v28 = vld [vmem:[%s4197_s1 + $0x218] sm:$0xff]  ;;  %v103_v30 = vld [vmem:[%s4197_s1 + $0x200] sm:$0xff] }
  0x1a   :  { %2499 = vmatprep.subr.bf16.mxu1 %v2498_v18  ;;  %v2490_v27 = vpack.c.bf16 %v120_v25, %v104_v24  ;;  %v122_v29 = vld [vmem:[%s4197_s1 + $0x298] sm:$0xff]  ;;  %v119_v32 = vld [vmem:[%s4197_s1 + $0x280] sm:$0xff]  ;;  %v105_v33 = vld [vmem:[%s4197_s1 + $0x210] sm:$0xff] }
  0x1b   :  { %v2502_v31 = vpack.c.bf16 %v122_v29, %v106_v28  ;;  %v121_v34 = vld [vmem:[%s4197_s1 + $0x290] sm:$0xff]  ;;  %v2492_v35 = vpack.c.bf16 %v119_v32, %v103_v30  ;;  %v44_v36 = vld [vmem:[%s4197_s1 + $0x28] sm:$0xff]  ;;  %v46_v39 = vld [vmem:[%s4197_s1 + $0x38] sm:$0xff] }
  0x1c   :  { %2489 = vmatpush1.bf16.msra.mxu0 %v2488_v22  ;;  %v2504_v37 = vpack.c.bf16 %v121_v34, %v105_v33  ;;  %v60_v38 = vld [vmem:[%s4197_s1 + $0xa8] sm:$0xff]  ;;  %v62_v40 = vld [vmem:[%s4197_s1 + $0xb8] sm:$0xff]  ;;  %v3023_v41 = vld [vmem:[%s4196_s0] sm:$0xff] }
  0x1d   :  { %2501 = vmatpush1.bf16.msra.mxu1 %v2500_v26  ;;  %2491 = vmatprep.subr.bf16.mxu0 %v2490_v27  ;;  %v2506_v42 = vpack.c.bf16 %v60_v38, %v44_v36  ;;  %v2518_v43 = vpack.c.bf16 %v62_v40, %v46_v39  ;;  %v43_v44 = vld [vmem:[%s4197_s1 + $0x20] sm:$0xff]  ;;  %v45_v46 = vld [vmem:[%s4197_s1 + $0x30] sm:$0xff]  ;;  %v76_v48 = vld [vmem:[%s4197_s1 + $0x128] sm:$0xff] }
  0x1e   :  { %2503 = vmatprep.subr.bf16.mxu1 %v2502_v31  ;;  %v59_v45 = vld [vmem:[%s4197_s1 + $0xa0] sm:$0xff]  ;;  %v61_v47 = vld [vmem:[%s4197_s1 + $0xb0] sm:$0xff]  ;;  %v92_v49 = vld [vmem:[%s4197_s1 + $0x1a8] sm:$0xff] }
  0x1f   :  { %v78_v50 = vld [vmem:[%s4197_s1 + $0x138] sm:$0xff]  ;;  %v2508_v52 = vpack.c.bf16 %v59_v45, %v43_v44  ;;  %v2520_v53 = vpack.c.bf16 %v61_v47, %v45_v46  ;;  %v2510_v54 = vpack.c.bf16 %v92_v49, %v76_v48  ;;  %v75_v55 = vld [vmem:[%s4197_s1 + $0x120] sm:$0xff]  ;;  %v77_v57 = vld [vmem:[%s4197_s1 + $0x130] sm:$0xff] }
  0x20   :  { %2493 = vmatpush1.bf16.msra.mxu0 %v2492_v35  ;;  %v94_v51 = vld [vmem:[%s4197_s1 + $0x1b8] sm:$0xff]  ;;  %v91_v56 = vld [vmem:[%s4197_s1 + $0x1a0] sm:$0xff]  ;;  %v93_v59 = vld [vmem:[%s4197_s1 + $0x1b0] sm:$0xff] }
  0x21   :  { %2505 = vmatpush1.bf16.msra.mxu1 %v2504_v37  ;;  %2507 = vmatprep.subr.bf16.mxu0 %v2506_v42  ;;  %v2522_v58 = vpack.c.bf16 %v94_v51, %v78_v50  ;;  %v108_v60 = vld [vmem:[%s4197_s1 + $0x228] sm:$0xff]  ;;  %v110_v63 = vld [vmem:[%s4197_s1 + $0x238] sm:$0xff]  ;;  %v2512_v2 = vpack.c.bf16 %v91_v56, %v75_v55  ;;  %v2524_v3 = vpack.c.bf16 %v93_v59, %v77_v57  ;;  %v107_v5 = vld [vmem:[%s4197_s1 + $0x220] sm:$0xff] }
  0x22   :  { %2519 = vmatprep.subr.bf16.mxu1 %v2518_v43  ;;  %v124_v61 = vld [vmem:[%s4197_s1 + $0x2a8] sm:$0xff]  ;;  %v126_v1 = vld [vmem:[%s4197_s1 + $0x2b8] sm:$0xff]  ;;  %v123_v6 = vld [vmem:[%s4197_s1 + $0x2a0] sm:$0xff] }
  0x23   :  { %2169 = vmatmul.mubr.msk.f32.vlgmr.msra.gmra.mrb[0].mxu0 %vm219_vm0, %v3023_v41  ;;  %v3075_v62 = vld [vmem:[%s4196_s0 + $0x8] sm:$0xff]  ;;  %v2514_v4 = vpack.c.bf16 %v124_v61, %v108_v60  ;;  %v109_v7 = vld [vmem:[%s4197_s1 + $0x230] sm:$0xff]  ;;  %v2526_v8 = vpack.c.bf16 %v126_v1, %v110_v63  ;;  %v50_v13 = vld [vmem:[%s4197_s1 + $0x58] sm:$0xff]  ;;  %v2516_v15 = vpack.c.bf16 %v123_v6, %v107_v5 }
  0x24   :  { %2173 = vmatmul.mubr.msk.f32.vlgmr.msra.gmra.mrb[0].mxu1 %vm219_vm0, %v3023_v41  ;;  %302 = vmatprep.mubr.f32.mxu0 %v2890_v0  ;;  %v125_v9 = vld [vmem:[%s4197_s1 + $0x2b0] sm:$0xff]  ;;  %v48_v10 = vld [vmem:[%s4197_s1 + $0x48] sm:$0xff]  ;;  %v66_v14 = vld [vmem:[%s4197_s1 + $0xd8] sm:$0xff] }
  0x25   :  { %391 = vmatprep.mubr.f32.mxu1 %v2890_v0  ;;  %2509 = vmatpush1.bf16.msra.mxu0 %v2508_v52  ;;  %v64_v11 = vld [vmem:[%s4197_s1 + $0xc8] sm:$0xff]  ;;  %v3110_v12 = vld [vmem:[%s4196_s0 + $0x10] sm:$0xff]  ;;  %v2528_v16 = vpack.c.bf16 %v125_v9, %v109_v7  ;;  %v2542_v18 = vpack.c.bf16 %v66_v14, %v50_v13  ;;  %v3127_v19 = vld [vmem:[%s4196_s0 + $0x18] sm:$0xff] }
  0x26   :  { %2521 = vmatpush1.bf16.msra.mxu1 %v2520_v53  ;;  %2511 = vmatprep.subr.bf16.mxu0 %v2510_v54  ;;  %v2530_v17 = vpack.c.bf16 %v64_v11, %v48_v10  ;;  %v47_v20 = vld [vmem:[%s4197_s1 + $0x40] sm:$0xff]  ;;  %v49_v22 = vld [vmem:[%s4197_s1 + $0x50] sm:$0xff]  ;;  %v80_v24 = vld [vmem:[%s4197_s1 + $0x148] sm:$0xff] }
  0x27   :  { %2170 = vmatmul.mubr.msk.f32.gmra.mrb[2].mxu0 %vm219_vm0, %v3075_v62  ;;  %2523 = vmatprep.subr.bf16.mxu1 %v2522_v58  ;;  %v63_v21 = vld [vmem:[%s4197_s1 + $0xc0] sm:$0xff]  ;;  %v65_v23 = vld [vmem:[%s4197_s1 + $0xd0] sm:$0xff]  ;;  %v96_v25 = vld [vmem:[%s4197_s1 + $0x1c8] sm:$0xff] }
  0x28   :  { %2174 = vmatmul.mubr.msk.f32.gmra.mrb[2].mxu1 %vm219_vm0, %v3075_v62  ;;  %308 = vmatprep.mubr.f32.mxu0 %v2890_v0  ;;  %v82_v26 = vld [vmem:[%s4197_s1 + $0x158] sm:$0xff]  ;;  %v2532_v28 = vpack.c.bf16 %v63_v21, %v47_v20  ;;  %v2544_v29 = vpack.c.bf16 %v65_v23, %v49_v22  ;;  %v2534_v30 = vpack.c.bf16 %v96_v25, %v80_v24  ;;  %v79_v31 = vld [vmem:[%s4197_s1 + $0x140] sm:$0xff]  ;;  %v81_v33 = vld [vmem:[%s4197_s1 + $0x150] sm:$0xff] }
  0x29   :  { %397 = vmatprep.mubr.f32.mxu1 %v2890_v0  ;;  %2513 = vmatpush1.bf16.msra.mxu0 %v2512_v2  ;;  %v98_v27 = vld [vmem:[%s4197_s1 + $0x1d8] sm:$0xff]  ;;  %v95_v32 = vld [vmem:[%s4197_s1 + $0x1c0] sm:$0xff]  ;;  %v97_v35 = vld [vmem:[%s4197_s1 + $0x1d0] sm:$0xff] }
  0x2a   :  { %2525 = vmatpush1.bf16.msra.mxu1 %v2524_v3  ;;  %2515 = vmatprep.subr.bf16.mxu0 %v2514_v4  ;;  %v2546_v34 = vpack.c.bf16 %v98_v27, %v82_v26  ;;  %v112_v36 = vld [vmem:[%s4197_s1 + $0x248] sm:$0xff]  ;;  %v114_v38 = vld [vmem:[%s4197_s1 + $0x258] sm:$0xff]  ;;  %v2536_v40 = vpack.c.bf16 %v95_v32, %v79_v31  ;;  %v2548_v42 = vpack.c.bf16 %v97_v35, %v81_v33  ;;  %v111_v44 = vld [vmem:[%s4197_s1 + $0x240] sm:$0xff] }
  0x2b   :  { %2171 = vmatmul.mubr.msk.f32.gmra.mrb[4].mxu0 %vm219_vm0, %v3110_v12  ;;  %2527 = vmatprep.subr.bf16.mxu1 %v2526_v8  ;;  %v128_v37 = vld [vmem:[%s4197_s1 + $0x2c8] sm:$0xff]  ;;  %v130_v39 = vld [vmem:[%s4197_s1 + $0x2d8] sm:$0xff]  ;;  %v127_v45 = vld [vmem:[%s4197_s1 + $0x2c0] sm:$0xff] }
  0x2c   :  { %2175 = vmatmul.mubr.msk.f32.gmra.mrb[4].mxu1 %vm219_vm0, %v3110_v12  ;;  %314 = vmatprep.mubr.f32.mxu0 %v2890_v0  ;;  %v2538_v43 = vpack.c.bf16 %v128_v37, %v112_v36  ;;  %v113_v46 = vld [vmem:[%s4197_s1 + $0x250] sm:$0xff]  ;;  %v2550_v47 = vpack.c.bf16 %v130_v39, %v114_v38  ;;  %v52_v49 = vld [vmem:[%s4197_s1 + $0x68] sm:$0xff]  ;;  %v54_v51 = vld [vmem:[%s4197_s1 + $0x78] sm:$0xff]  ;;  %v2540_v53 = vpack.c.bf16 %v127_v45, %v111_v44 }
  0x2d   :  { %403 = vmatprep.mubr.f32.mxu1 %v2890_v0  ;;  %2517 = vmatpush1.bf16.msra.mxu0 %v2516_v15  ;;  %v129_v48 = vld [vmem:[%s4197_s1 + $0x2d0] sm:$0xff]  ;;  %v68_v50 = vld [vmem:[%s4197_s1 + $0xe8] sm:$0xff]  ;;  %v70_v52 = vld [vmem:[%s4197_s1 + $0xf8] sm:$0xff] }
  0x2e   :  { %2529 = vmatpush1.bf16.msra.mxu1 %v2528_v16  ;;  %2531 = vmatprep.subr.bf16.mxu0 %v2530_v17  ;;  %v2552_v54 = vpack.c.bf16 %v129_v48, %v113_v46  ;;  %v2554_v55 = vpack.c.bf16 %v68_v50, %v52_v49  ;;  %v2566_v56 = vpack.c.bf16 %v70_v52, %v54_v51  ;;  %v51_v57 = vld [vmem:[%s4197_s1 + $0x60] sm:$0xff]  ;;  %v53_v59 = vld [vmem:[%s4197_s1 + $0x70] sm:$0xff]  ;;  %v84_v61 = vld [vmem:[%s4197_s1 + $0x168] sm:$0xff] }
  0x2f   :  { %2172 = vmatmul.mubr.msk.f32.gmra.mrb[6].mxu0 %vm219_vm0, %v3127_v19  ;;  %2543 = vmatprep.subr.bf16.mxu1 %v2542_v18  ;;  %v67_v58 = vld [vmem:[%s4197_s1 + $0xe0] sm:$0xff]  ;;  %v69_v60 = vld [vmem:[%s4197_s1 + $0xf0] sm:$0xff]  ;;  %v100_v63 = vld [vmem:[%s4197_s1 + $0x1e8] sm:$0xff] }
  0x30   :  { %2176 = vmatmul.mubr.msk.f32.gmra.mrb[6].mxu1 %vm219_vm0, %v3127_v19  ;;  %474 = vmatprep.mubr.f32.mxu0 %v2890_v0  ;;  %v86_v1 = vld [vmem:[%s4197_s1 + $0x178] sm:$0xff]  ;;  %v2556_v3 = vpack.c.bf16 %v67_v58, %v51_v57  ;;  %v2568_v4 = vpack.c.bf16 %v69_v60, %v53_v59  ;;  %v2558_v5 = vpack.c.bf16 %v100_v63, %v84_v61  ;;  %v83_v6 = vld [vmem:[%s4197_s1 + $0x160] sm:$0xff]  ;;  %v85_v8 = vld [vmem:[%s4197_s1 + $0x170] sm:$0xff] }
  0x31   :  { %563 = vmatprep.mubr.f32.mxu1 %v2890_v0  ;;  %v102_v2 = vld [vmem:[%s4197_s1 + $0x1f8] sm:$0xff]  ;;  %v99_v7 = vld [vmem:[%s4197_s1 + $0x1e0] sm:$0xff]  ;;  %v101_v10 = vld [vmem:[%s4197_s1 + $0x1f0] sm:$0xff] }
  0x32   :  { %v2570_v9 = vpack.c.bf16 %v102_v2, %v86_v1  ;;  %v116_v11 = vld [vmem:[%s4197_s1 + $0x268] sm:$0xff]  ;;  %v118_v14 = vld [vmem:[%s4197_s1 + $0x278] sm:$0xff]  ;;  %v2560_v16 = vpack.c.bf16 %v99_v7, %v83_v6  ;;  %v2572_v17 = vpack.c.bf16 %v101_v10, %v85_v8  ;;  %v115_v20 = vld [vmem:[%s4197_s1 + $0x260] sm:$0xff] }
  0x33   :  { %2177 = vmatmul.mubr.msk.f32.vlgmr.msra.gmra.mrb[8].mxu0 %vm219_vm0, %v3023_v41  ;;  %v132_v13 = vld [vmem:[%s4197_s1 + $0x2e8] sm:$0xff]  ;;  %v134_v15 = vld [vmem:[%s4197_s1 + $0x2f8] sm:$0xff]  ;;  %v131_v21 = vld [vmem:[%s4197_s1 + $0x2e0] sm:$0xff] }
  0x34   :  { %2181 = vmatmul.mubr.msk.f32.vlgmr.msra.gmra.mrb[8].mxu1 %vm219_vm0, %v3023_v41  ;;  %480 = vmatprep.mubr.f32.mxu0 %v2890_v0  ;;  %v2562_v18 = vpack.c.bf16 %v132_v13, %v116_v11  ;;  %v2574_v22 = vpack.c.bf16 %v134_v15, %v118_v14  ;;  %v117_v23 = vld [vmem:[%s4197_s1 + $0x270] sm:$0xff]  ;;  %v2564_v25 = vpack.c.bf16 %v131_v21, %v115_v20  ;;  %v1313_v27 = vld [vmem:[#allocation2 + $0x180] sm:$0xff]  ;;  %v1266_v31 = vld [vmem:[#allocation2 + $0x8] sm:$0xff] }
  0x35   :  { %569 = vmatprep.mubr.f32.mxu1 %v2890_v0  ;;  %2533 = vmatpush1.bf16.msra.mxu0 %v2532_v28  ;;  %v133_v24 = vld [vmem:[%s4197_s1 + $0x2f0] sm:$0xff]  ;;  %v1284_v36 = vld [vmem:[#allocation2 + $0x98] sm:$0xff]  ;;  %v1286_v48 = vld [vmem:[#allocation2 + $0xa8] sm:$0xff] }
  0x36   :  { %2545 = vmatpush1.bf16.msra.mxu1 %v2544_v29  ;;  %2535 = vmatprep.subr.bf16.mxu0 %v2534_v30  ;;  %v2576_v26 = vpack.c.bf16 %v133_v24, %v117_v23  ;;  %v1314_v29 = vld [vmem:[#allocation2 + $0x188] sm:$0xff]  ;;  %v1265_v30 = vld [vmem:[#allocation2] sm:$0xff]  ;;  %v1315_v37 = vld [vmem:[#allocation2 + $0x190] sm:$0xff] }
  0x37   :  { %2178 = vmatmul.mubr.msk.f32.gmra.mrb[10].mxu0 %vm219_vm0, %v3075_v62  ;;  %2547 = vmatprep.subr.bf16.mxu1 %v2546_v34  ;;  %v2610_v32 = vpack.c.bf16 %v1314_v29, %v1313_v27  ;;  %v2580_v33 = vpack.c.bf16 %v1266_v31, %v1265_v30  ;;  %v1298_v34 = vld [vmem:[#allocation2 + $0x108] sm:$0xff]  ;;  %v1316_v38 = vld [vmem:[#allocation2 + $0x198] sm:$0xff]  ;;  %v1267_v39 = vld [vmem:[#allocation2 + $0x10] sm:$0xff] }
  0x38   :  { %2182 = vmatmul.mubr.msk.f32.gmra.mrb[10].mxu1 %vm219_vm0, %v3075_v62  ;;  %486 = vmatprep.mubr.f32.mxu0 %v2890_v0  ;;  %v1299_v44 = vld [vmem:[#allocation2 + $0x110] sm:$0xff]  ;;  %v1300_v45 = vld [vmem:[#allocation2 + $0x118] sm:$0xff]  ;;  %v1317_v49 = vld [vmem:[#allocation2 + $0x1a0] sm:$0xff] }
  0x39   :  { %575 = vmatprep.mubr.f32.mxu1 %v2890_v0  ;;  %2537 = vmatpush1.bf16.msra.mxu0 %v2536_v40  ;;  %v1268_v40 = vld [vmem:[#allocation2 + $0x18] sm:$0xff]  ;;  %v2616_v46 = vpack.c.bf16 %v1300_v45, %v1299_v44  ;;  %v1318_v51 = vld [vmem:[#allocation2 + $0x1a8] sm:$0xff]  ;;  %v1269_v52 = vld [vmem:[#allocation2 + $0x20] sm:$0xff] }
  0x3a   :  { %2549 = vmatpush1.bf16.msra.mxu1 %v2548_v42  ;;  %2539 = vmatprep.subr.bf16.mxu0 %v2538_v43  ;;  %v2614_v42 = vpack.c.bf16 %v1316_v38, %v1315_v37  ;;  %v2584_v43 = vpack.c.bf16 %v1268_v40, %v1267_v39  ;;  %v1302_v57 = vld [vmem:[#allocation2 + $0x128] sm:$0xff]  ;;  %v1287_v59 = vld [vmem:[#allocation2 + $0xb0] sm:$0xff]  ;;  %v1288_v60 = vld [vmem:[#allocation2 + $0xb8] sm:$0xff] }
  0x3b   :  { %2179 = vmatmul.mubr.msk.f32.gmra.mrb[12].mxu0 %vm219_vm0, %v3110_v12  ;;  %2551 = vmatprep.subr.bf16.mxu1 %v2550_v47  ;;  %v1285_v47 = vld [vmem:[#allocation2 + $0xa0] sm:$0xff]  ;;  %v1319_v61 = vld [vmem:[#allocation2 + $0x1b0] sm:$0xff]  ;;  %v2590_v63 = vpack.c.bf16 %v1288_v60, %v1287_v59  ;;  %v1320_v1 = vld [vmem:[#allocation2 + $0x1b8] sm:$0xff] }
  0x3c   :  { %2183 = vmatmul.mubr.msk.f32.gmra.mrb[12].mxu1 %vm219_vm0, %v3110_v12  ;;  %492 = vmatprep.mubr.f32.mxu0 %v2890_v0  ;;  %v2586_v50 = vpack.c.bf16 %v1286_v48, %v1285_v47  ;;  %v1271_v2 = vld [vmem:[#allocation2 + $0x30] sm:$0xff]  ;;  %v1304_v7 = vld [vmem:[#allocation2 + $0x138] sm:$0xff]  ;;  %v1290_v10 = vld [vmem:[#allocation2 + $0xc8] sm:$0xff] }
  0x3d   :  { %581 = vmatprep.mubr.f32.mxu1 %v2890_v0  ;;  %2541 = vmatpush1.bf16.msra.mxu0 %v2540_v53  ;;  %v1270_v53 = vld [vmem:[#allocation2 + $0x28] sm:$0xff]  ;;  %v1303_v6 = vld [vmem:[#allocation2 + $0x130] sm:$0xff]  ;;  %v1321_v11 = vld [vmem:[#allocation2 + $0x1c0] sm:$0xff] }
  0x3e   :  { %2553 = vmatpush1.bf16.msra.mxu1 %v2552_v54  ;;  %2555 = vmatprep.subr.bf16.mxu0 %v2554_v55  ;;  %v2618_v54 = vpack.c.bf16 %v1318_v51, %v1317_v49  ;;  %v2588_v55 = vpack.c.bf16 %v1270_v53, %v1269_v52  ;;  %v2624_v8 = vpack.c.bf16 %v1304_v7, %v1303_v6  ;;  %v1322_v14 = vld [vmem:[#allocation2 + $0x1c8] sm:$0xff]  ;;  %v1273_v15 = vld [vmem:[#allocation2 + $0x40] sm:$0xff]  ;;  %v1291_v23 = vld [vmem:[#allocation2 + $0xd0] sm:$0xff] }
  0x3f   :  { %2180 = vmatmul.mubr.msk.f32.gmra.mrb[14].mxu0 %vm219_vm0, %v3127_v19  ;;  %2567 = vmatprep.subr.bf16.mxu1 %v2566_v56  ;;  %v1301_v56 = vld [vmem:[#allocation2 + $0x120] sm:$0xff]  ;;  %v1306_v21 = vld [vmem:[#allocation2 + $0x148] sm:$0xff]  ;;  %v1292_v24 = vld [vmem:[#allocation2 + $0xd8] sm:$0xff] }
  0x40   :  { %2184 = vmatmul.mubr.msk.f32.gmra.mrb[14].mxu1 %vm219_vm0, %v3127_v19  ;;  %652 = vmatprep.mubr.f32.mxu0 %v2890_v0  ;;  %v2620_v58 = vpack.c.bf16 %v1302_v57, %v1301_v56  ;;  %v1305_v20 = vld [vmem:[#allocation2 + $0x140] sm:$0xff]  ;;  %v1276_v27 = vld [vmem:[#allocation2 + $0x58] sm:$0xff]  ;;  %v1307_v30 = vld [vmem:[#allocation2 + $0x150] sm:$0xff] }
  0x41   :  { %741 = vmatprep.mubr.f32.mxu1 %v2890_v0  ;;  %v1308_v31 = vld [vmem:[#allocation2 + $0x158] sm:$0xff]  ;;  %v1277_v37 = vld [vmem:[#allocation2 + $0x60] sm:$0xff]  ;;  %v1310_v40 = vld [vmem:[#allocation2 + $0x168] sm:$0xff] }
  0x42   :  { %v1309_v38 = vld [vmem:[#allocation2 + $0x160] sm:$0xff]  ;;  %v1296_v44 = vld [vmem:[#allocation2 + $0xf8] sm:$0xff]  ;;  %v1327_v45 = vld [vmem:[#allocation2 + $0x1f0] sm:$0xff] }
  0x43   :  { %2185 = vmatmul.mubr.msk.f32.vlgmr.msra.gmra.mrb[16].mxu0 %vm219_vm0, %v3023_v41  ;;  %v1328_v47 = vld [vmem:[#allocation2 + $0x1f8] sm:$0xff]  ;;  %v1279_v48 = vld [vmem:[#allocation2 + $0x70] sm:$0xff]  ;;  %v1346_v56 = vld [vmem:[#allocation2 + $0x288] sm:$0xff] }
  0x44   :  { %2189 = vmatmul.mubr.msk.f32.vlgmr.msra.gmra.mrb[16].mxu1 %vm219_vm0, %v3023_v41  ;;  %658 = vmatprep.mubr.f32.mxu0 %v2890_v0  ;;  %v1280_v49 = vld [vmem:[#allocation2 + $0x78] sm:$0xff]  ;;  %v1311_v52 = vld [vmem:[#allocation2 + $0x170] sm:$0xff]  ;;  %v1377_v57 = vld [vmem:[#allocation2 + $0x380] sm:$0xff] }
  0x45   :  { %747 = vmatprep.mubr.f32.mxu1 %v2890_v0  ;;  %2557 = vmatpush1.bf16.msra.mxu0 %v2556_v3  ;;  %v1272_v3 = vld [vmem:[#allocation2 + $0x38] sm:$0xff]  ;;  %v2608_v51 = vpack.c.bf16 %v1280_v49, %v1279_v48  ;;  %v1378_v59 = vld [vmem:[#allocation2 + $0x388] sm:$0xff]  ;;  %v3448_v48 = vld [vmem:[#allocation2 + $0x240] sm:$0xff] }
  0x46   :  { %2569 = vmatpush1.bf16.msra.mxu1 %v2568_v4  ;;  %2559 = vmatprep.subr.bf16.mxu0 %v2558_v5  ;;  %v2622_v4 = vpack.c.bf16 %v1320_v1, %v1319_v61  ;;  %v2592_v5 = vpack.c.bf16 %v1272_v3, %v1271_v2  ;;  %v1312_v53 = vld [vmem:[#allocation2 + $0x178] sm:$0xff]  ;;  %v2674_v60 = vpack.c.bf16 %v1378_v59, %v1377_v57  ;;  %v139_v61 = vlaneseq  ;;  %v135_v1 = vld [vmem:[%s4198_s2] sm:$0xff]  ;;  %v3450_v49 = vld [vmem:[#allocation2 + $0x248] sm:$0xff] }
  0x47   :  { %2186 = vmatmul.mubr.msk.f32.gmra.mrb[18].mxu0 %vm219_vm0, %v3075_v62  ;;  %2571 = vmatprep.subr.bf16.mxu1 %v2570_v9  ;;  %v1289_v9 = vld [vmem:[#allocation2 + $0xc0] sm:$0xff]  ;;  %4346 = vst [vmem:[#allocation38_spill] sm:$0xff] %v3448_v48  ;;  %4347 = vst [vmem:[#allocation39_spill] sm:$0xff] %v3450_v49  ;;  %v3468_v57 = vld [vmem:[#allocation2 + $0x2d8] sm:$0xff] }
  0x48   :  { %2190 = vmatmul.mubr.msk.f32.gmra.mrb[18].mxu1 %vm219_vm0, %v3075_v62  ;;  %664 = vmatprep.mubr.f32.mxu0 %v2890_v0  ;;  %v2594_v13 = vpack.c.bf16 %v1290_v10, %v1289_v9  ;;  %v3350_v9 = vld [vmem:[#allocation2 + $0x200] sm:$0xff]  ;;  %v3352_v10 = vld [vmem:[#allocation2 + $0x208] sm:$0xff]  ;;  %4351 = vst [vmem:[#allocation43_spill] sm:$0xff] %v3468_v57  ;;  %v3644_v57 = vld [vmem:[#allocation2 + $0x5b8] sm:$0xff] }
  0x49   :  { %753 = vmatprep.mubr.f32.mxu1 %v2890_v0  ;;  %2561 = vmatpush1.bf16.msra.mxu0 %v2560_v16  ;;  %v1274_v16 = vld [vmem:[#allocation2 + $0x48] sm:$0xff]  ;;  %4400 = vst [vmem:[#allocation88_spill] sm:$0xff] %v3644_v57  ;;  %v3724_v57 = vld [vmem:[#allocation2 + $0x5d8] sm:$0xff] }
  0x4a   :  { %2573 = vmatpush1.bf16.msra.mxu1 %v2572_v17  ;;  %2563 = vmatprep.subr.bf16.mxu0 %v2562_v18  ;;  %v2626_v17 = vpack.c.bf16 %v1322_v14, %v1321_v11  ;;  %v2596_v18 = vpack.c.bf16 %v1274_v16, %v1273_v15  ;;  %v3354_v11 = vld [vmem:[#allocation2 + $0x300] sm:$0xff]  ;;  %v3358_v14 = vld [vmem:[#allocation2 + $0x290] sm:$0xff]  ;;  %v3360_v15 = vld [vmem:[#allocation2 + $0x298] sm:$0xff]  ;;  %4421 = vst [vmem:[#allocation106_spill] sm:$0xff] %v3724_v57 }
  0x4b   :  { %2187 = vmatmul.mubr.msk.f32.gmra.mrb[20].mxu0 %vm219_vm0, %v3110_v12  ;;  %2575 = vmatprep.subr.bf16.mxu1 %v2574_v22  ;;  %v2628_v22 = vpack.c.bf16 %v1306_v21, %v1305_v20  ;;  %4316 = vst [vmem:[#allocation8_spill] sm:$0xff] %v3354_v11  ;;  %4318 = vst [vmem:[#allocation10_spill] sm:$0xff] %v3358_v14  ;;  %v3367_v20 = vld [vmem:[#allocation2 + $0x210] sm:$0xff]  ;;  %v3369_v21 = vld [vmem:[#allocation2 + $0x218] sm:$0xff] }
  0x4c   :  { %2191 = vmatmul.mubr.msk.f32.gmra.mrb[20].mxu1 %vm219_vm0, %v3110_v12  ;;  %670 = vmatprep.mubr.f32.mxu0 %v2890_v0  ;;  %4319 = vst [vmem:[#allocation11_spill] sm:$0xff] %v3360_v15  ;;  %4322 = vst [vmem:[#allocation14_spill] sm:$0xff] %v3367_v20  ;;  %v3492_v59 = vld [vmem:[#allocation2 + $0x2e8] sm:$0xff]  ;;  %v3586_v20 = vld [vmem:[#allocation2 + $0x590] sm:$0xff] }
  0x4d   :  { %759 = vmatprep.mubr.f32.mxu1 %v2890_v0  ;;  %2565 = vmatpush1.bf16.msra.mxu0 %v2564_v25  ;;  %v1323_v25 = vld [vmem:[#allocation2 + $0x1d0] sm:$0xff]  ;;  %4323 = vst [vmem:[#allocation15_spill] sm:$0xff] %v3369_v21  ;;  %4355 = vst [vmem:[#allocation47_spill] sm:$0xff] %v3492_v59  ;;  %v3588_v21 = vld [vmem:[#allocation2 + $0x598] sm:$0xff] }
  0x4e   :  { %2577 = vmatpush1.bf16.msra.mxu1 %v2576_v26  ;;  %v2598_v26 = vpack.c.bf16 %v1292_v24, %v1291_v23  ;;  %v3373_v23 = vld [vmem:[#allocation2 + $0x318] sm:$0xff]  ;;  %v3375_v24 = vld [vmem:[#allocation2 + $0x2a0] sm:$0xff]  ;;  %4383 = vst [vmem:[#allocation71_spill] sm:$0xff] %v3586_v20  ;;  %4384 = vst [vmem:[#allocation72_spill] sm:$0xff] %v3588_v21 }
  0x4f   :  { %2188 = vmatmul.mubr.msk.f32.gmra.mrb[22].mxu0 %vm219_vm0, %v3127_v19  ;;  %2611 = vmatprep.subr.bf16.mxu1 %v2610_v32  ;;  %v2632_v32 = vpack.c.bf16 %v1308_v31, %v1307_v30  ;;  %4325 = vst [vmem:[#allocation17_spill] sm:$0xff] %v3373_v23  ;;  %4326 = vst [vmem:[#allocation18_spill] sm:$0xff] %v3375_v24  ;;  %v3391_v30 = vld [vmem:[#allocation2 + $0x2b0] sm:$0xff]  ;;  %v3393_v31 = vld [vmem:[#allocation2 + $0x2b8] sm:$0xff] }
  0x50   :  { %2192 = vmatmul.mubr.msk.f32.gmra.mrb[22].mxu1 %vm219_vm0, %v3127_v19  ;;  %830 = vmatprep.mubr.f32.mxu0 %v2890_v0  ;;  %4334 = vst [vmem:[#allocation26_spill] sm:$0xff] %v3391_v30  ;;  %4335 = vst [vmem:[#allocation27_spill] sm:$0xff] %v3393_v31  ;;  %v3510_v24 = vld [vmem:[#allocation2 + $0x360] sm:$0xff]  ;;  %v3543_v30 = vld [vmem:[#allocation2 + $0x488] sm:$0xff] }
  0x51   :  { %919 = vmatprep.mubr.f32.mxu1 %v2890_v0  ;;  %4358 = vst [vmem:[#allocation50_spill] sm:$0xff] %v3510_v24  ;;  %4370 = vst [vmem:[#allocation61_spill] sm:$0xff] %v3543_v30  ;;  %v3562_v23 = vld [vmem:[#allocation2 + $0x408] sm:$0xff]  ;;  %v3614_v15 = vld [vmem:[#allocation2 + $0x420] sm:$0xff] }
  0x52   :  { %4375 = vst [vmem:[#allocation65_spill] sm:$0xff] %v3562_v23  ;;  %v3612_v14 = vld [vmem:[#allocation2 + $0x5a8] sm:$0xff]  ;;  %4393 = vst [vmem:[#allocation81_spill] sm:$0xff] %v3614_v15  ;;  %v3630_v59 = vld [vmem:[#allocation2 + $0x4b0] sm:$0xff] }
  0x53   :  { %2193 = vmatmul.mubr.msk.f32.vlgmr.msra.gmra.mrb[24].mxu0 %vm219_vm0, %v3023_v41  ;;  %4392 = vst [vmem:[#allocation80_spill] sm:$0xff] %v3612_v14  ;;  %v3616_v11 = vld [vmem:[#allocation2 + $0x428] sm:$0xff]  ;;  %4397 = vst [vmem:[#allocation85_spill] sm:$0xff] %v3630_v59  ;;  %v3642_v24 = vld [vmem:[#allocation2 + $0x5b0] sm:$0xff] }
  0x54   :  { %2197 = vmatmul.mubr.msk.f32.vlgmr.msra.gmra.mrb[24].mxu1 %vm219_vm0, %v3023_v41  ;;  %836 = vmatprep.mubr.f32.mxu0 %v2890_v0  ;;  %v1281_v41 = vld [vmem:[#allocation2 + $0x80] sm:$0xff]  ;;  %4394 = vst [vmem:[#allocation82_spill] sm:$0xff] %v3616_v11  ;;  %4399 = vst [vmem:[#allocation87_spill] sm:$0xff] %v3642_v24  ;;  %v3722_v24 = vld [vmem:[#allocation2 + $0x5d0] sm:$0xff] }
  0x55   :  { %925 = vmatprep.mubr.f32.mxu1 %v2890_v0  ;;  %4420 = vst [vmem:[#allocation105_spill] sm:$0xff] %v3722_v24 }
  0x57   :  { %2194 = vmatmul.mubr.msk.f32.gmra.mrb[26].mxu0 %vm219_vm0, %v3075_v62 }
  0x58   :  { %2198 = vmatmul.mubr.msk.f32.gmra.mrb[26].mxu1 %vm219_vm0, %v3075_v62  ;;  %842 = vmatprep.mubr.f32.mxu0 %v2890_v0  ;;  %v1282_v62 = vld [vmem:[#allocation2 + $0x88] sm:$0xff] }
  0x59   :  { %931 = vmatprep.mubr.f32.mxu1 %v2890_v0  ;;  %v2578_v28 = vpack.c.bf16 %v1282_v62, %v1281_v41  ;;  %v1324_v41 = vld [vmem:[#allocation2 + $0x1d8] sm:$0xff]  ;;  %v1275_v62 = vld [vmem:[#allocation2 + $0x50] sm:$0xff] }
  0x5a   :  { %v2600_v29 = vpack.c.bf16 %v1276_v27, %v1275_v62  ;;  %v3383_v62 = vld [vmem:[#allocation2 + $0x220] sm:$0xff]  ;;  %v3385_v27 = vld [vmem:[#allocation2 + $0x228] sm:$0xff] }
  0x5b   :  { %2195 = vmatmul.mubr.msk.f32.gmra.mrb[28].mxu0 %vm219_vm0, %v3110_v12  ;;  %2579 = vmatprep.subr.bf16.mxu0 %v2578_v28  ;;  %v2630_v28 = vpack.c.bf16 %v1324_v41, %v1323_v25  ;;  %v3377_v25 = vld [vmem:[#allocation2 + $0x2a8] sm:$0xff]  ;;  %4330 = vst [vmem:[#allocation22_spill] sm:$0xff] %v3383_v62  ;;  %4331 = vst [vmem:[#allocation23_spill] sm:$0xff] %v3385_v27  ;;  %v3531_v62 = vld [vmem:[#allocation2 + $0x3f8] sm:$0xff] }
  0x5c   :  { %2199 = vmatmul.mubr.msk.f32.gmra.mrb[28].mxu1 %vm219_vm0, %v3110_v12  ;;  %848 = vmatprep.mubr.f32.mxu0 %v2890_v0  ;;  %v1297_v12 = vld [vmem:[#allocation2 + $0x100] sm:$0xff]  ;;  %4327 = vst [vmem:[#allocation19_spill] sm:$0xff] %v3377_v25  ;;  %v3381_v41 = vld [vmem:[#allocation2 + $0x3a8] sm:$0xff]  ;;  %4364 = vst [vmem:[#allocation55_spill] sm:$0xff] %v3531_v62 }
  0x5d   :  { %937 = vmatprep.mubr.f32.mxu1 %v2890_v0  ;;  %v2612_v35 = vpack.c.bf16 %v1298_v34, %v1297_v12  ;;  %2581 = vmatpush3.bf16.msra.mxu0 %v2580_v33  ;;  %v1283_v0 = vld [vmem:[#allocation2 + $0x90] sm:$0xff]  ;;  %v1293_v33 = vld [vmem:[#allocation2 + $0xe0] sm:$0xff]  ;;  %v1294_v12 = vld [vmem:[#allocation2 + $0xe8] sm:$0xff]  ;;  %4329 = vst [vmem:[#allocation21_spill] sm:$0xff] %v3381_v41 }
  0x5e   :  { %v1325_v34 = vld [vmem:[#allocation2 + $0x1e0] sm:$0xff]  ;;  %v3533_v27 = vld [vmem:[#allocation2 + $0x270] sm:$0xff]  ;;  %v3535_v41 = vld [vmem:[#allocation2 + $0x278] sm:$0xff] }
  0x5f   :  { %2196 = vmatmul.mubr.msk.f32.gmra.mrb[30].mxu0 %vm219_vm0, %v3127_v19  ;;  %2613 = vmatpush3.bf16.msra.mxu1 %v2612_v35  ;;  %v2602_v35 = vpack.c.bf16 %v1294_v12, %v1293_v33  ;;  %4365 = vst [vmem:[#allocation56_spill] sm:$0xff] %v3533_v27  ;;  %4366 = vst [vmem:[#allocation57_spill] sm:$0xff] %v3535_v41  ;;  %v3558_v25 = vld [vmem:[#allocation2 + $0x588] sm:$0xff] }
  0x60   :  { %2200 = vmatmul.mubr.msk.f32.gmra.mrb[30].mxu1 %vm219_vm0, %v3127_v19  ;;  %v2582_v19 = vpack.c.bf16 %v1284_v36, %v1283_v0  ;;  %2615 = vmatprep.subr.bf16.mxu1 %v2614_v42  ;;  %v1326_v0 = vld [vmem:[#allocation2 + $0x1e8] sm:$0xff]  ;;  %v2636_v42 = vpack.c.bf16 %v1310_v40, %v1309_v38  ;;  %4373 = vst [vmem:[#allocation63_spill] sm:$0xff] %v3558_v25 }
  0x61   :  { %v2634_v36 = vpack.c.bf16 %v1326_v0, %v1325_v34  ;;  %v3407_v34 = vld [vmem:[#allocation2 + $0x3b0] sm:$0xff]  ;;  %v3422_v38 = vld [vmem:[%s4198_s2 + $0x8] sm:$0xff] }
  0x62   :  { %2583 = vmatprep.subr.bf16.mxu0 %v2582_v19  ;;  %v1278_v19 = vld [vmem:[#allocation2 + $0x68] sm:$0xff]  ;;  %4336 = vst [vmem:[#allocation28_spill] sm:$0xff] %v3407_v34  ;;  %v3411_v0 = vld [vmem:[#allocation2 + $0x230] sm:$0xff]  ;;  %v3539_v34 = vld [vmem:[#allocation2 + $0x378] sm:$0xff] }
  0x63   :  { %2585 = vmatpush3.bf16.msra.mxu0 %v2584_v43  ;;  %2617 = vmatpush3.bf16.msra.mxu1 %v2616_v46  ;;  %v2604_v39 = vpack.c.bf16 %v1278_v19, %v1277_v37  ;;  %v1295_v43 = vld [vmem:[#allocation2 + $0xf0] sm:$0xff]  ;;  %4338 = vst [vmem:[#allocation30_spill] sm:$0xff] %v3411_v0  ;;  %v3417_v19 = vld [vmem:[#allocation2 + $0x338] sm:$0xff]  ;;  %4368 = vst [vmem:[#allocation59_spill] sm:$0xff] %v3539_v34 }
  0x64   :  { %2587 = vmatprep.subr.bf16.mxu0 %v2586_v50  ;;  %2619 = vmatprep.subr.bf16.mxu1 %v2618_v54  ;;  %v2606_v46 = vpack.c.bf16 %v1296_v44, %v1295_v43  ;;  %v2638_v50 = vpack.c.bf16 %v1328_v47, %v1327_v45  ;;  %v2640_v54 = vpack.c.bf16 %v1312_v53, %v1311_v52  ;;  %v3415_v37 = vld [vmem:[#allocation2 + $0x330] sm:$0xff]  ;;  %v3440_v44 = vld [vmem:[#allocation2 + $0x2c0] sm:$0xff]  ;;  %v3442_v45 = vld [vmem:[#allocation2 + $0x2c8] sm:$0xff] }
  0x65   :  { %4340 = vst [vmem:[#allocation32_spill] sm:$0xff] %v3415_v37  ;;  %4341 = vst [vmem:[#allocation33_spill] sm:$0xff] %v3417_v19  ;;  %v3446_v47 = vld [vmem:[#allocation2 + $0x3c8] sm:$0xff]  ;;  %v3480_v53 = vld [vmem:[#allocation2 + $0x3d8] sm:$0xff] }
  0x66   :  { %4342 = vst [vmem:[#allocation34_spill] sm:$0xff] %v3440_v44  ;;  %4343 = vst [vmem:[#allocation35_spill] sm:$0xff] %v3442_v45  ;;  %v3482_v52 = vld [vmem:[#allocation2 + $0x250] sm:$0xff]  ;;  %v3566_v44 = vld [vmem:[#allocation2 + $0x508] sm:$0xff] }
  0x67   :  { %2589 = vmatpush3.bf16.msra.mxu0 %v2588_v55  ;;  %2621 = vmatpush3.bf16.msra.mxu1 %v2620_v58  ;;  %v1345_v55 = vld [vmem:[#allocation2 + $0x280] sm:$0xff]  ;;  %4345 = vst [vmem:[#allocation37_spill] sm:$0xff] %v3446_v47  ;;  %4377 = vst [vmem:[#allocation67_spill] sm:$0xff] %v3566_v44  ;;  %v3568_v37 = vld [vmem:[#allocation2 + $0x490] sm:$0xff] }
  0x68   :  { %2591 = vmatprep.subr.bf16.mxu0 %v2590_v63  ;;  %2623 = vmatprep.subr.bf16.mxu1 %v2622_v4  ;;  %v2642_v58 = vpack.c.bf16 %v1346_v56, %v1345_v55  ;;  %v3338_v63 = vshrl.u32 %v139_v61, 7  ;;  %v3464_v55 = vld [vmem:[#allocation2 + $0x348] sm:$0xff]  ;;  %v3466_v56 = vld [vmem:[#allocation2 + $0x2d0] sm:$0xff]  ;;  %v3516_v61 = vld [vmem:[#allocation2 + $0x2f8] sm:$0xff]  ;;  %4378 = vst [vmem:[#allocation68_spill] sm:$0xff] %v3568_v37 }
  0x69   :  { %4349 = vst [vmem:[#allocation41_spill] sm:$0xff] %v3464_v55  ;;  %4350 = vst [vmem:[#allocation42_spill] sm:$0xff] %v3466_v56  ;;  %v3598_v55 = vld [vmem:[#allocation2 + $0x4a0] sm:$0xff]  ;;  %v3658_v56 = vld [vmem:[#allocation2 + $0x530] sm:$0xff] }
  0x6a   :  { %v4209_v2 = vsub.s32 0, %v3338_v63  ;;  %v4208_v3 = vsub.s32 1, %v3338_v63  ;;  %v4207_v4 = vsub.s32 2, %v3338_v63  ;;  %v4205_v6 = vsub.s32 4, %v3338_v63  ;;  %4361 = vst [vmem:[#allocation53_spill] sm:$0xff] %v3516_v61  ;;  %4389 = vst [vmem:[#allocation77_spill] sm:$0xff] %v3598_v55 }
  0x6b   :  { %2593 = vmatpush3.bf16.msra.mxu0 %v2592_v5  ;;  %2625 = vmatpush3.bf16.msra.mxu1 %v2624_v8  ;;  %v4206_v5 = vsub.s32 3, %v3338_v63  ;;  %v4203_v7 = vsub.s32 6, %v3338_v63  ;;  %v4204_v8 = vsub.s32 5, %v3338_v63  ;;  %v4202_v16 = vsub.s32 7, %v3338_v63  ;;  %4403 = vst [vmem:[#allocation91_spill] sm:$0xff] %v3658_v56  ;;  %v3670_v45 = vld [vmem:[#allocation2 + $0x4c0] sm:$0xff] }
  0x6c   :  { %2595 = vmatprep.subr.bf16.mxu0 %v2594_v13  ;;  %2627 = vmatprep.subr.bf16.mxu1 %v2626_v17  ;;  %v3356_v13 = vld [vmem:[#allocation2 + $0x308] sm:$0xff]  ;;  %v3363_v17 = vld [vmem:[#allocation2 + $0x390] sm:$0xff]  ;;  %v3401_v33 = vrot.slane %v135_v1, %v4208_v3  ;;  %v3405_v12 = vrot.slane %v135_v1, %v4207_v4  ;;  %v3430_v40 = vrot.slane %v135_v1, %v4205_v6  ;;  %v3506_v3 = vld [vmem:[#allocation2 + $0x260] sm:$0xff]  ;;  %v4362_v31 = vsub.s32 0, %v3338_v63 }
  0x6d   :  { %4317 = vst [vmem:[#allocation9_spill] sm:$0xff] %v3356_v13  ;;  %4320 = vst [vmem:[#allocation12_spill] sm:$0xff] %v3363_v17  ;;  %v3438_v43 = vrot.slane %v135_v1, %v4204_v8  ;;  %v3504_v4 = vld [vmem:[#allocation2 + $0x3e8] sm:$0xff]  ;;  %v3537_v8 = vld [vmem:[#allocation2 + $0x370] sm:$0xff]  ;;  %v4371_v19 = vsub.s32 1, %v3338_v63  ;;  %v4381_v49 = vsub.s32 3, %v3338_v63 }
  0x6e   :  { %4356 = vst [vmem:[#allocation48_spill] sm:$0xff] %v3506_v3  ;;  %4367 = vst [vmem:[#allocation58_spill] sm:$0xff] %v3537_v8  ;;  %v3541_v6 = vld [vmem:[#allocation2 + $0x480] sm:$0xff]  ;;  %v3590_v17 = vld [vmem:[#allocation2 + $0x410] sm:$0xff]  ;;  %v4411_v61 = vsub.s32 4, %v3338_v63 }
  0x6f   :  { %2597 = vmatpush3.bf16.msra.mxu0 %v2596_v18  ;;  %2629 = vmatpush3.bf16.msra.mxu1 %v2628_v22  ;;  %v3365_v18 = vld [vmem:[#allocation2 + $0x398] sm:$0xff]  ;;  %v3371_v22 = vld [vmem:[#allocation2 + $0x310] sm:$0xff]  ;;  %4369 = vst [vmem:[#allocation60_spill] sm:$0xff] %v3541_v6  ;;  %v3552_v0 = vrot.slane %v3422_v38, %v4371_v19  ;;  %v3582_v47 = vrot.slane %v3422_v38, %v4381_v49  ;;  %4385 = vst [vmem:[#allocation73_spill] sm:$0xff] %v3590_v17  ;;  %v4412_v49 = vsub.s32 5, %v3338_v63 }
  0x70   :  { %2599 = vmatprep.subr.bf16.mxu0 %v2598_v26  ;;  %2631 = vmatprep.subr.bf16.mxu1 %v2630_v28  ;;  %4321 = vst [vmem:[#allocation13_spill] sm:$0xff] %v3365_v18  ;;  %4324 = vst [vmem:[#allocation16_spill] sm:$0xff] %v3371_v22  ;;  %v3379_v26 = vld [vmem:[#allocation2 + $0x3a0] sm:$0xff]  ;;  %v3592_v19 = vld [vmem:[#allocation2 + $0x418] sm:$0xff] }
  0x71   :  { %4328 = vst [vmem:[#allocation20_spill] sm:$0xff] %v3379_v26  ;;  %v3387_v28 = vld [vmem:[#allocation2 + $0x320] sm:$0xff]  ;;  %v3514_v26 = vld [vmem:[#allocation2 + $0x2f0] sm:$0xff]  ;;  %4382 = vst [vmem:[#allocation70_spill] sm:$0xff] %v3582_v47  ;;  %v3702_v59 = vrot.slane %v3422_v38, %v4412_v49 }
  0x72   :  { %4332 = vst [vmem:[#allocation24_spill] sm:$0xff] %v3387_v28  ;;  %4360 = vst [vmem:[#allocation52_spill] sm:$0xff] %v3514_v26  ;;  %v3527_v28 = vrot.slane %v3422_v38, %v4362_v31  ;;  %v3560_v22 = vld [vmem:[#allocation2 + $0x400] sm:$0xff]  ;;  %v3600_v18 = vld [vmem:[#allocation2 + $0x4a8] sm:$0xff] }
  0x73   :  { %2601 = vmatpush3.bf16.msra.mxu0 %v2600_v29  ;;  %2633 = vmatpush3.bf16.msra.mxu1 %v2632_v32  ;;  %v3389_v29 = vld [vmem:[#allocation2 + $0x328] sm:$0xff]  ;;  %v3397_v32 = vrot.slane %v135_v1, %v4209_v2  ;;  %4374 = vst [vmem:[#allocation64_spill] sm:$0xff] %v3560_v22  ;;  %v3564_v31 = vld [vmem:[#allocation2 + $0x500] sm:$0xff]  ;;  %4386 = vst [vmem:[#allocation74_spill] sm:$0xff] %v3592_v19 }
  0x74   :  { %2603 = vmatprep.subr.bf16.mxu0 %v2602_v35  ;;  %2635 = vmatprep.subr.bf16.mxu1 %v2634_v36  ;;  %4333 = vst [vmem:[#allocation25_spill] sm:$0xff] %v3389_v29  ;;  %v3409_v35 = vld [vmem:[#allocation2 + $0x3b8] sm:$0xff]  ;;  %v3508_v2 = vld [vmem:[#allocation2 + $0x268] sm:$0xff]  ;;  %v3529_v29 = vld [vmem:[#allocation2 + $0x3f0] sm:$0xff] }
  0x75   :  { %4337 = vst [vmem:[#allocation29_spill] sm:$0xff] %v3409_v35  ;;  %v3413_v36 = vld [vmem:[#allocation2 + $0x238] sm:$0xff]  ;;  %4357 = vst [vmem:[#allocation49_spill] sm:$0xff] %v3508_v2  ;;  %v3556_v35 = vld [vmem:[#allocation2 + $0x580] sm:$0xff] }
  0x76   :  { %4339 = vst [vmem:[#allocation31_spill] sm:$0xff] %v3413_v36  ;;  %4363 = vst [vmem:[#allocation54_spill] sm:$0xff] %v3529_v29  ;;  %v4380_v36 = vsub.s32 2, %v3338_v63  ;;  %v3610_v47 = vld [vmem:[#allocation2 + $0x5a0] sm:$0xff]  ;;  %v3646_v26 = vld [vmem:[#allocation2 + $0x430] sm:$0xff] }
  0x77   :  { %2605 = vmatpush3.bf16.msra.mxu0 %v2604_v39  ;;  %2637 = vmatpush3.bf16.msra.mxu1 %v2636_v42  ;;  %v3426_v39 = vrot.slane %v135_v1, %v4206_v5  ;;  %v3434_v42 = vrot.slane %v135_v1, %v4203_v7  ;;  %v3490_v7 = vld [vmem:[#allocation2 + $0x2e0] sm:$0xff]  ;;  %4372 = vst [vmem:[#allocation62_spill] sm:$0xff] %v3556_v35  ;;  %4376 = vst [vmem:[#allocation66_spill] sm:$0xff] %v3564_v31  ;;  %v3656_v8 = vld [vmem:[#allocation2 + $0x438] sm:$0xff] }
  0x78   :  { %2607 = vmatprep.subr.bf16.mxu0 %v2606_v46  ;;  %2639 = vmatprep.subr.bf16.mxu1 %v2638_v50  ;;  %v3444_v46 = vld [vmem:[#allocation2 + $0x3c0] sm:$0xff]  ;;  %v3454_v50 = vrot.slane %v135_v1, %v4202_v16  ;;  %v3478_v1 = vld [vmem:[#allocation2 + $0x3d0] sm:$0xff]  ;;  %4354 = vst [vmem:[#allocation46_spill] sm:$0xff] %v3490_v7  ;;  %v3577_v48 = vrot.slane %v3422_v38, %v4380_v36  ;;  %v3596_v36 = vld [vmem:[#allocation2 + $0x518] sm:$0xff] }
  0x79   :  { %4344 = vst [vmem:[#allocation36_spill] sm:$0xff] %v3444_v46  ;;  %v3486_v16 = vld [vmem:[#allocation2 + $0x350] sm:$0xff]  ;;  %v3502_v5 = vld [vmem:[#allocation2 + $0x3e0] sm:$0xff]  ;;  %v3570_v46 = vld [vmem:[#allocation2 + $0x498] sm:$0xff] }
  0x7a   :  { %4352 = vst [vmem:[#allocation44_spill] sm:$0xff] %v3486_v16  ;;  %4379 = vst [vmem:[#allocation69_spill] sm:$0xff] %v3570_v46  ;;  %v3618_v13 = vld [vmem:[#allocation2 + $0x520] sm:$0xff]  ;;  %v3628_v7 = vld [vmem:[#allocation2 + $0x528] sm:$0xff] }
  0x7b   :  { %2609 = vmatpush3.bf16.msra.mxu0 %v2608_v51  ;;  %2641 = vmatpush3.bf16.msra.mxu1 %v2640_v54  ;;  %v3462_v54 = vld [vmem:[#allocation2 + $0x340] sm:$0xff]  ;;  %v3484_v51 = vld [vmem:[#allocation2 + $0x258] sm:$0xff]  ;;  %4388 = vst [vmem:[#allocation76_spill] sm:$0xff] %v3596_v36  ;;  %4390 = vst [vmem:[#allocation78_spill] sm:$0xff] %v3600_v18 }
  0x7c   :  { %2643 = vmatprep.subr.bf16.mxu0 %v2642_v58  ;;  %2675 = vmatprep.subr.bf16.mxu1 %v2674_v60  ;;  %4348 = vst [vmem:[#allocation40_spill] sm:$0xff] %v3462_v54  ;;  %v3488_v58 = vld [vmem:[#allocation2 + $0x358] sm:$0xff]  ;;  %v3512_v60 = vld [vmem:[#allocation2 + $0x368] sm:$0xff]  ;;  %v3594_v54 = vld [vmem:[#allocation2 + $0x510] sm:$0xff] }
  0x7d   :  { %4353 = vst [vmem:[#allocation45_spill] sm:$0xff] %v3488_v58  ;;  %4359 = vst [vmem:[#allocation51_spill] sm:$0xff] %v3512_v60  ;;  %v3632_v16 = vld [vmem:[#allocation2 + $0x4b8] sm:$0xff]  ;;  %v3672_v37 = vld [vmem:[#allocation2 + $0x4c8] sm:$0xff]  ;;  %v3697_v58 = vrot.slane %v3422_v38, %v4411_v61 }
  0x7e   :  { %4387 = vst [vmem:[#allocation75_spill] sm:$0xff] %v3594_v54  ;;  %4391 = vst [vmem:[#allocation79_spill] sm:$0xff] %v3610_v47  ;;  %v3660_v6 = vld [vmem:[#allocation2 + $0x538] sm:$0xff]  ;;  %v3674_v46 = vld [vmem:[#allocation2 + $0x5c0] sm:$0xff] }
  0x7f   :  { %4395 = vst [vmem:[#allocation83_spill] sm:$0xff] %v3618_v13  ;;  %4396 = vst [vmem:[#allocation84_spill] sm:$0xff] %v3628_v7  ;;  %v3684_v55 = vld [vmem:[#allocation2 + $0x5c8] sm:$0xff]  ;;  %v3686_v18 = vld [vmem:[#allocation2 + $0x440] sm:$0xff] }
  0x80   :  { %4398 = vst [vmem:[#allocation86_spill] sm:$0xff] %v3632_v16  ;;  %4401 = vst [vmem:[#allocation89_spill] sm:$0xff] %v3646_v26  ;;  %v3688_v54 = vld [vmem:[#allocation2 + $0x448] sm:$0xff]  ;;  %v3704_v16 = vld [vmem:[#allocation2 + $0x540] sm:$0xff]  ;;  %v4417_v26 = vsub.s32 6, %v3338_v63 }
  0x81   :  { %4402 = vst [vmem:[#allocation90_spill] sm:$0xff] %v3656_v8  ;;  %4404 = vst [vmem:[#allocation92_spill] sm:$0xff] %v3660_v6  ;;  %v3706_v13 = vld [vmem:[#allocation2 + $0x548] sm:$0xff]  ;;  %v3708_v7 = vld [vmem:[#allocation2 + $0x4d0] sm:$0xff] }
  0x82   :  { %4405 = vst [vmem:[#allocation93_spill] sm:$0xff] %v3670_v45  ;;  %4406 = vst [vmem:[#allocation94_spill] sm:$0xff] %v3672_v37  ;;  %v3718_v8 = vrot.slane %v3422_v38, %v4417_v26  ;;  %v3720_v49 = vld [vmem:[#allocation2 + $0x4d8] sm:$0xff]  ;;  %v3732_v45 = vld [vmem:[#allocation2 + $0x450] sm:$0xff] }
  0x83   :  { %4407 = vst [vmem:[#allocation95_spill] sm:$0xff] %v3674_v46  ;;  %4408 = vst [vmem:[#allocation96_spill] sm:$0xff] %v3684_v55  ;;  %v3734_v26 = vld [vmem:[#allocation2 + $0x458] sm:$0xff] }
  0x84   :  { %4409 = vst [vmem:[#allocation97_spill] sm:$0xff] %v3686_v18  ;;  %4410 = vst [vmem:[#allocation98_spill] sm:$0xff] %v3688_v54 }
  0x85   :  { %4413 = vst [vmem:[#allocation99_spill] sm:$0xff] %v3702_v59  ;;  %4414 = vst [vmem:[#allocation100_spill] sm:$0xff] %v3704_v16 }
  0x86   :  { %4415 = vst [vmem:[#allocation101_spill] sm:$0xff] %v3706_v13  ;;  %4416 = vst [vmem:[#allocation102_spill] sm:$0xff] %v3708_v7 }
  0x87   :  { %4418 = vst [vmem:[#allocation103_spill] sm:$0xff] %v3718_v8  ;;  %4419 = vst [vmem:[#allocation104_spill] sm:$0xff] %v3720_v49  ;;  %v3760_v49 = vld [vmem:[#allocation2 + $0x4e8] sm:$0xff] }
  0x88   :  { %4422 = vst [vmem:[#allocation107_spill] sm:$0xff] %v3732_v45  ;;  %4423 = vst [vmem:[#allocation108_spill] sm:$0xff] %v3734_v26 }
  0x89   :  { %4429 = vst [vmem:[#allocation113_spill] sm:$0xff] %v3760_v49 }
  0xf6   :  { %v298_v30 = vpop.f32.mrb[0].mxu0 }
  0xf7   :  { %v300_v31 = vpop.f32.mrb[1].mxu0  ;;  %v387_v44 = vpop.f32.mrb[0].mxu1  ;;  %v299_v17 = vadd.f32 %v298_v30, %v3397_v32 }
  0xf8   :  { %v389_v36 = vpop.f32.mrb[1].mxu1  ;;  %v301_v15 = vadd.f32 %v300_v31, %v3401_v33  ;;  %v388_v30 = vadd.f32 %v387_v44, %v3405_v12  ;;  %v4424_v31 = vsub.s32 7, %v3338_v63 }
  0xf9   :  { %v390_v37 = vadd.f32 %v389_v36, %v3426_v39  ;;  %v944_v46 = vmax.f32 %v299_v17, 0.0 }
  0xfa   :  { %v304_v11 = vpop.f32.mrb[2].mxu0  ;;  %v3743_v34 = vrot.slane %v3422_v38, %v4424_v31  ;;  %v3754_v38 = vld [vmem:[#allocation2 + $0x550] sm:$0xff]  ;;  %v3756_v31 = vld [vmem:[#allocation2 + $0x558] sm:$0xff]  ;;  %v946_v16 = vmax.f32 %v388_v30, 0.0 }
  0xfb   :  { %v305_v56 = vadd.f32 %v304_v11, %v3397_v32  ;;  %v393_v6 = vpop.f32.mrb[2].mxu1  ;;  %v306_v47 = vpop.f32.mrb[3].mxu0  ;;  %4426 = vst [vmem:[#allocation110_spill] sm:$0xff] %v3754_v38  ;;  %4427 = vst [vmem:[#allocation111_spill] sm:$0xff] %v3756_v31  ;;  %v947_v17 = vmax.f32 %v390_v37, 0.0 }
  0xfc   :  { %4425 = vst [vmem:[#allocation109_spill] sm:$0xff] %v3743_v34  ;;  %v394_v61 = vadd.f32 %v393_v6, %v3405_v12  ;;  %v307_v18 = vadd.f32 %v306_v47, %v3401_v33  ;;  %v395_v54 = vpop.f32.mrb[3].mxu1  ;;  %v3758_v6 = vld [vmem:[#allocation2 + $0x4e0] sm:$0xff]  ;;  %v945_v47 = vmax.f32 %v301_v15, 0.0 }
  0xfd   :  { %v960_v55 = vmax.f32 %v305_v56, 0.0  ;;  %v396_v44 = vadd.f32 %v395_v54, %v3426_v39  ;;  %4428 = vst [vmem:[#allocation112_spill] sm:$0xff] %v3758_v6 }
  0xfe   :  { %v962_v13 = vmax.f32 %v394_v61, 0.0  ;;  %v961_v36 = vmax.f32 %v307_v18, 0.0  ;;  %v310_v7 = vpop.f32.mrb[4].mxu0 }
  0xff   :  { %v1008_v56 = vadd.f32 %v960_v55, %v944_v46  ;;  %v963_v11 = vmax.f32 %v396_v44, 0.0  ;;  %v311_v54 = vadd.f32 %v310_v7, %v3397_v32  ;;  %v312_v24 = vpop.f32.mrb[5].mxu0  ;;  %v399_v63 = vpop.f32.mrb[4].mxu1 }
 0x100   :  { %v1022_v45 = vadd.f32 %v962_v13, %v946_v16  ;;  %v1015_v26 = vadd.f32 %v961_v36, %v945_v47  ;;  %v313_v57 = vadd.f32 %v312_v24, %v3401_v33  ;;  %v401_v14 = vpop.f32.mrb[5].mxu1  ;;  %v400_v30 = vadd.f32 %v399_v63, %v3405_v12 }
 0x101   :  { %v1009_v61 = vrot.slane %v1008_v56, 4  ;;  %v1029_v18 = vadd.f32 %v963_v11, %v947_v17  ;;  %v976_v7 = vmax.f32 %v311_v54, 0.0  ;;  %v402_v44 = vadd.f32 %v401_v14, %v3426_v39 }
 0x102   :  { %v1023_v46 = vrot.slane %v1022_v45, 4  ;;  %v1016_v55 = vrot.slane %v1015_v26, 4  ;;  %v316_v13 = vpop.f32.mrb[6].mxu0  ;;  %v977_v24 = vmax.f32 %v313_v57, 0.0 }
 0x103   :  { %v1010_v16 = vadd.f32 %v1009_v61, %v1008_v56  ;;  %v1030_v36 = vrot.slane %v1029_v18, 4  ;;  %v317_v47 = vadd.f32 %v316_v13, %v3397_v32  ;;  %v405_v19 = vpop.f32.mrb[6].mxu1  ;;  %v318_v15 = vpop.f32.mrb[7].mxu0  ;;  %v978_v56 = vmax.f32 %v400_v30, 0.0 }
 0x104   :  { %v1024_v38 = vadd.f32 %v1023_v46, %v1022_v45  ;;  %v1017_v11 = vadd.f32 %v1016_v55, %v1015_v26  ;;  %v406_v63 = vadd.f32 %v405_v19, %v3405_v12  ;;  %v319_v17 = vadd.f32 %v318_v15, %v3401_v33  ;;  %v407_v37 = vpop.f32.mrb[7].mxu1 }
 0x105   :  { %v1011_v6 = vrot.slane %v1010_v16, 2  ;;  %v1031_v49 = vadd.f32 %v1030_v36, %v1029_v18  ;;  %v992_v54 = vmax.f32 %v317_v47, 0.0  ;;  %v408_v14 = vadd.f32 %v407_v37, %v3426_v39 }
 0x106   :  { %v1025_v31 = vrot.slane %v1024_v38, 2  ;;  %v994_v61 = vmax.f32 %v406_v63, 0.0  ;;  %v993_v57 = vmax.f32 %v319_v17, 0.0  ;;  %v476_v20 = vpop.f32.mrb[8].mxu0  ;;  %v979_v13 = vmax.f32 %v402_v44, 0.0 }
 0x107   :  { %v1012_v32 = vadd.f32 %v1011_v6, %v1010_v16  ;;  %v1120_v21 = vadd.f32 %v992_v54, %v976_v7  ;;  %v995_v45 = vmax.f32 %v408_v14, 0.0  ;;  %v565_v26 = vpop.f32.mrb[8].mxu1  ;;  %v478_v46 = vpop.f32.mrb[9].mxu0  ;;  %v1018_v19 = vrot.slane %v1017_v11, 2 }
 0x108   :  { %v1026_v12 = vadd.f32 %v1025_v31, %v1024_v38  ;;  %v1134_v33 = vadd.f32 %v994_v61, %v978_v56  ;;  %v1127_v15 = vadd.f32 %v993_v57, %v977_v24  ;;  %v567_v55 = vpop.f32.mrb[9].mxu1  ;;  %v1032_v36 = vrot.slane %v1031_v49, 2 }
 0x109   :  { %v1013_v18 = vrot.slane %v1012_v32, 1  ;;  %v1121_v47 = vrot.slane %v1120_v21, 4  ;;  %v1141_v39 = vadd.f32 %v995_v45, %v979_v13  ;;  %v477_v17 = vadd.f32 %v476_v20, %v3430_v40 }
 0x10a   :  { %v1027_v37 = vrot.slane %v1026_v12, 1  ;;  %v1135_v30 = vrot.slane %v1134_v33, 4  ;;  %v1128_v63 = vrot.slane %v1127_v15, 4  ;;  %v482_v6 = vpop.f32.mrb[10].mxu0  ;;  %v566_v54 = vadd.f32 %v565_v26, %v3434_v42 }
 0x10b   :  { %v1014_v44 = vadd.f32 %v1013_v18, %v1012_v32  ;;  %v1122_v7 = vadd.f32 %v1121_v47, %v1120_v21  ;;  %v1142_v16 = vrot.slane %v1141_v39, 4  ;;  %v571_v38 = vpop.f32.mrb[10].mxu1  ;;  %v484_v31 = vpop.f32.mrb[11].mxu0  ;;  %v3776_v24 = vadd.f32 %v1018_v19, %v1017_v11 }
 0x10c   :  { %v1028_v14 = vadd.f32 %v1027_v37, %v1026_v12  ;;  %v1136_v56 = vadd.f32 %v1135_v30, %v1134_v33  ;;  %v1129_v61 = vadd.f32 %v1128_v63, %v1127_v15  ;;  %v573_v57 = vpop.f32.mrb[11].mxu1  ;;  %v3778_v13 = vadd.f32 %v1032_v36, %v1031_v49 }
 0x10d   :  { %v1123_v45 = vrot.slane %v1122_v7, 2  ;;  %v1143_v22 = vadd.f32 %v1142_v16, %v1141_v39  ;;  %v948_v23 = vmax.f32 %v477_v17, 0.0  ;;  %v3780_v20 = vmul.f32 0.0625, %v1014_v44 }
 0x10e   :  { %v1137_v32 = vrot.slane %v1136_v56, 2  ;;  %v950_v21 = vmax.f32 %v566_v54, 0.0  ;;  %v479_v18 = vadd.f32 %v478_v46, %v3438_v43  ;;  %v488_v26 = vpop.f32.mrb[12].mxu0  ;;  %v1130_v35 = vrot.slane %v1129_v61, 2 }
 0x10f   :  { %v1124_v47 = vadd.f32 %v1123_v45, %v1122_v7  ;;  %v568_v11 = vadd.f32 %v567_v55, %v3454_v50  ;;  %v483_v12 = vadd.f32 %v482_v6, %v3430_v40  ;;  %v577_v19 = vpop.f32.mrb[12].mxu1  ;;  %v490_v33 = vpop.f32.mrb[13].mxu0  ;;  %v3785_v49 = vmul.f32 0.0625, %v1028_v14 }
 0x110   :  { %v1138_v15 = vadd.f32 %v1137_v32, %v1136_v56  ;;  %v1144_v36 = vrot.slane %v1143_v22, 2  ;;  %v572_v39 = vadd.f32 %v571_v38, %v3434_v42  ;;  %v579_v37 = vpop.f32.mrb[13].mxu1  ;;  %v949_v63 = vmax.f32 %v479_v18, 0.0 }
 0x111   :  { %v1125_v30 = vrot.slane %v1124_v47, 1  ;;  %v951_v17 = vmax.f32 %v568_v11, 0.0  ;;  %v964_v46 = vmax.f32 %v483_v12, 0.0  ;;  %v485_v16 = vadd.f32 %v484_v31, %v3438_v43 }
 0x112   :  { %v1139_v44 = vrot.slane %v1138_v15, 1  ;;  %v966_v7 = vmax.f32 %v572_v39, 0.0  ;;  %v574_v55 = vadd.f32 %v573_v57, %v3454_v50  ;;  %v494_v6 = vpop.f32.mrb[14].mxu0  ;;  %v3790_v54 = vadd.f32 %v1130_v35, %v1129_v61 }
 0x113   :  { %v1036_v14 = vadd.f32 %v964_v46, %v948_v23  ;;  %v489_v56 = vadd.f32 %v488_v26, %v3430_v40  ;;  %v578_v45 = vadd.f32 %v577_v19, %v3434_v42  ;;  %v583_v38 = vpop.f32.mrb[14].mxu1  ;;  %v496_v32 = vpop.f32.mrb[15].mxu0  ;;  %v3794_v25 = vadd.f32 %v1144_v36, %v1143_v22 }
 0x114   :  { %v1050_v18 = vadd.f32 %v966_v7, %v950_v21  ;;  %v965_v11 = vmax.f32 %v485_v16, 0.0  ;;  %v967_v12 = vmax.f32 %v574_v55, 0.0  ;;  %v585_v39 = vpop.f32.mrb[15].mxu1  ;;  %v1126_v34 = vadd.f32 %v1125_v30, %v1124_v47 }
 0x115   :  { %v1140_v31 = vadd.f32 %v1139_v44, %v1138_v15  ;;  %v1037_v27 = vrot.slane %v1036_v14, 4  ;;  %v980_v57 = vmax.f32 %v489_v56, 0.0  ;;  %v982_v23 = vmax.f32 %v578_v45, 0.0 }
 0x116   :  { %v1051_v41 = vrot.slane %v1050_v18, 4  ;;  %v1043_v35 = vadd.f32 %v965_v11, %v949_v63  ;;  %v1057_v61 = vadd.f32 %v967_v12, %v951_v17  ;;  %v3796_v46 = vpop.f32.mrb[16].mxu0  ;;  %v491_v19 = vadd.f32 %v490_v33, %v3438_v43 }
 0x117   :  { %v1038_v26 = vadd.f32 %v1037_v27, %v1036_v14  ;;  %v580_v22 = vadd.f32 %v579_v37, %v3454_v50  ;;  %v495_v21 = vadd.f32 %v494_v6, %v3430_v40  ;;  %v3801_v36 = vpop.f32.mrb[17].mxu0  ;;  %v3803_v7 = vpop.f32.mrb[16].mxu1  ;;  %v584_v63 = vadd.f32 %v583_v38, %v3434_v42 }
 0x118   :  { %v1052_v47 = vadd.f32 %v1051_v41, %v1050_v18  ;;  %v1044_v15 = vrot.slane %v1043_v35, 4  ;;  %v1058_v30 = vrot.slane %v1057_v61, 4  ;;  %v3806_v17 = vpop.f32.mrb[17].mxu1  ;;  %v981_v16 = vmax.f32 %v491_v19, 0.0 }
 0x119   :  { %v1039_v44 = vrot.slane %v1038_v26, 2  ;;  %v983_v27 = vmax.f32 %v580_v22, 0.0  ;;  %v996_v55 = vmax.f32 %v495_v21, 0.0  ;;  %v998_v56 = vmax.f32 %v584_v63, 0.0 }
 0x11a   :  { %v1053_v33 = vrot.slane %v1052_v47, 2  ;;  %v1045_v14 = vadd.f32 %v1044_v15, %v1043_v35  ;;  %v1059_v37 = vadd.f32 %v1058_v30, %v1057_v61  ;;  %v3808_v40 = vpop.f32.mrb[18].mxu0  ;;  %v497_v45 = vadd.f32 %v496_v32, %v3438_v43 }
 0x11b   :  { %v3810_v6 = vadd.f32 %v1039_v44, %v1038_v26  ;;  %v1148_v41 = vadd.f32 %v996_v55, %v980_v57  ;;  %v586_v42 = vadd.f32 %v585_v39, %v3454_v50  ;;  %v3814_v38 = vpop.f32.mrb[19].mxu0  ;;  %v3816_v18 = vpop.f32.mrb[18].mxu1  ;;  %v1249_v11 = vmul.f32 0.0625, %v1126_v34 }
 0x11c   :  { %v1251_v12 = vmul.f32 0.0625, %v1140_v31  ;;  %v3818_v19 = vadd.f32 %v1053_v33, %v1052_v47  ;;  %v1162_v35 = vadd.f32 %v998_v56, %v982_v23  ;;  %v3820_v61 = vpop.f32.mrb[19].mxu1  ;;  %v1046_v22 = vrot.slane %v1045_v14, 2 }
 0x11d   :  { %v1149_v21 = vrot.slane %v1148_v41, 4  ;;  %v997_v26 = vmax.f32 %v497_v45, 0.0  ;;  %v999_v15 = vmax.f32 %v586_v42, 0.0  ;;  %v1060_v50 = vrot.slane %v1059_v37, 2 }
 0x11e   :  { %v1163_v32 = vrot.slane %v1162_v35, 4  ;;  %v3824_v39 = vpop.f32.mrb[20].mxu0  ;;  %v1020_v47 = vrot.slane %v3776_v24, 1  ;;  %v1132_v55 = vrot.slane %v3790_v54, 1  ;;  %v1034_v33 = vrot.slane %v3778_v13, 1 }
 0x11f   :  { %v1150_v30 = vadd.f32 %v1149_v21, %v1148_v41  ;;  %v1155_v34 = vadd.f32 %v997_v26, %v981_v16  ;;  %v1169_v31 = vadd.f32 %v999_v15, %v983_v27  ;;  %v3827_v23 = vpop.f32.mrb[21].mxu0  ;;  %v3829_v63 = vpop.f32.mrb[20].mxu1  ;;  %v1146_v56 = vrot.slane %v3794_v25, 1 }
 0x120   :  { %v1164_v44 = vadd.f32 %v1163_v32, %v1162_v35  ;;  %v3834_v45 = vpop.f32.mrb[21].mxu1  ;;  %v1021_v16 = vadd.f32 %v1020_v47, %v3776_v24  ;;  %v1133_v21 = vadd.f32 %v1132_v55, %v3790_v54  ;;  %v1035_v26 = vadd.f32 %v1034_v33, %v3778_v13 }
 0x121   :  { %v1151_v42 = vrot.slane %v1150_v30, 2  ;;  %v1156_v43 = vrot.slane %v1155_v34, 4  ;;  %v1170_v41 = vrot.slane %v1169_v31, 4  ;;  %v1147_v35 = vadd.f32 %v1146_v56, %v3794_v25 }
 0x122   :  { %v1165_v27 = vrot.slane %v1164_v44, 2  ;;  %v3840_v15 = vpop.f32.mrb[22].mxu0  ;;  %v1047_v32 = vadd.f32 %v1046_v22, %v1045_v14  ;;  %v1061_v57 = vadd.f32 %v1060_v50, %v1059_v37  ;;  %v1234_v60 = vmul.f32 0.0625, %v1021_v16 }
 0x123   :  { %v1157_v8 = vadd.f32 %v1156_v43, %v1155_v34  ;;  %v1171_v29 = vadd.f32 %v1170_v41, %v1169_v31  ;;  %v3842_v62 = vpop.f32.mrb[23].mxu0  ;;  %v3844_v59 = vpop.f32.mrb[22].mxu1  ;;  %v1250_v3 = vmul.f32 0.0625, %v1133_v21  ;;  %v1236_v24 = vmul.f32 0.0625, %v1035_v26  ;;  %v4435_v21 = vld [vmem:[#allocation10_spill] sm:$0xff]  ;;  %v4437_v26 = vld [vmem:[#allocation13_spill] sm:$0xff] }
 0x124   :  { %v1252_v47 = vmul.f32 0.0625, %v1147_v35  ;;  %v3846_v2 = vpop.f32.mrb[23].mxu1  ;;  %v3848_v54 = vadd.f32 %v1151_v42, %v1150_v30  ;;  %v1561_v14 = vsel %vm1560_vm1, %v1249_v11, %v3780_v20  ;;  %v3852_v37 = vadd.f32 %v1165_v27, %v1164_v44  ;;  %v4432_v44 = vld [vmem:[#allocation8_spill] sm:$0xff]  ;;  %v4434_v27 = vld [vmem:[#allocation11_spill] sm:$0xff] }
 0x125   :  { %v1158_v13 = vrot.slane %v1157_v8, 2  ;;  %v1172_v25 = vrot.slane %v1171_v29, 2  ;;  %v1562_v22 = vsel %vm1560_vm1, %v1250_v3, %v1234_v60  ;;  %v1563_v50 = vsel %vm1560_vm1, %v1251_v12, %v3785_v49  ;;  %v4431_v12 = vld [vmem:[#allocation9_spill] sm:$0xff] }
 0x126   :  { %v1564_v43 = vsel %vm1560_vm1, %v1252_v47, %v1236_v24  ;;  %v3858_v34 = vpop.f32.mrb[24].mxu0  ;;  %1657 = vmatprep.mubr.f32.mxu0 %v1562_v22  ;;  %v655_v30 = vadd.f32 %v3796_v46, %v3527_v28  ;;  %v1048_v33 = vrot.slane %v1047_v32, 1  ;;  %v1062_v3 = vrot.slane %v1061_v57, 1 }
 0x127   :  { %v1159_v31 = vadd.f32 %v1158_v13, %v1157_v8  ;;  %v1173_v55 = vadd.f32 %v1172_v25, %v1171_v29  ;;  %1727 = vmatprep.mubr.f32.mxu1 %v1564_v43  ;;  %v3862_v20 = vpop.f32.mrb[25].mxu0  ;;  %v3864_v11 = vpop.f32.mrb[24].mxu1  ;;  %1658 = vmatmul.mubr.f32.vlgmr.msra.gmra.mrb[32].mxu0 %v1561_v14  ;;  %v657_v60 = vadd.f32 %v3801_v36, %v3552_v0 }
 0x128   :  { %1728 = vmatmul.mubr.f32.vlgmr.msra.gmra.mrb[32].mxu1 %v1563_v50  ;;  %v661_v8 = vadd.f32 %v3808_v40, %v3527_v28  ;;  %v744_v29 = vadd.f32 %v3803_v7, %v3577_v48  ;;  %v3872_v49 = vpop.f32.mrb[25].mxu1  ;;  %v4430_v46 = vpack.c.bf16 %v3352_v10, %v3350_v9  ;;  %v4433_v56 = vpack.c.bf16 %v4431_v12, %v4432_v44  ;;  %v4438_v7 = vld [vmem:[#allocation12_spill] sm:$0xff] }
 0x129   :  { %v952_v42 = vmax.f32 %v655_v30, 0.0  ;;  %v1049_v41 = vadd.f32 %v1048_v33, %v1047_v32  ;;  %v1160_v16 = vrot.slane %v1159_v31, 1  ;;  %v1174_v36 = vrot.slane %v1173_v55, 1 }
 0x12a   :  { %2645 = vmatpush3.bf16.msra.mxu0 %v4430_v46  ;;  %2677 = vmatpush3.bf16.msra.mxu1 %v4433_v56  ;;  %v4436_v40 = vpack.c.bf16 %v4434_v27, %v4435_v21  ;;  %v4439_v35 = vpack.c.bf16 %v4437_v26, %v4438_v7  ;;  %v1063_v24 = vadd.f32 %v1062_v3, %v1061_v57  ;;  %v953_v47 = vmax.f32 %v657_v60, 0.0  ;;  %v3886_v13 = vpop.f32.mrb[26].mxu0  ;;  %v4440_v46 = vld [vmem:[#allocation70_spill] sm:$0xff]  ;;  %v4451_v27 = vld [vmem:[#allocation20_spill] sm:$0xff] }
 0x12b   :  { %v968_v9 = vmax.f32 %v661_v8, 0.0  ;;  %v954_v10 = vmax.f32 %v744_v29, 0.0  ;;  %v1161_v25 = vadd.f32 %v1160_v16, %v1159_v31  ;;  %v1238_v14 = vmul.f32 0.0625, %v1049_v41  ;;  %v3890_v43 = vpop.f32.mrb[27].mxu0  ;;  %v3892_v50 = vpop.f32.mrb[26].mxu1  ;;  %v4441_v31 = vld [vmem:[#allocation15_spill] sm:$0xff] }
 0x12c   :  { %2647 = vmatprep.subr.bf16.mxu0 %v4436_v40  ;;  %2679 = vmatprep.subr.bf16.mxu1 %v4439_v35  ;;  %v1175_v22 = vadd.f32 %v1174_v36, %v1173_v55  ;;  %v663_v32 = vadd.f32 %v3814_v38, %v3552_v0  ;;  %v1240_v30 = vmul.f32 0.0625, %v1063_v24  ;;  %v746_v57 = vadd.f32 %v3806_v17, %v4440_v46  ;;  %v3898_v60 = vpop.f32.mrb[27].mxu1  ;;  %v4442_v8 = vld [vmem:[#allocation14_spill] sm:$0xff]  ;;  %v4444_v29 = vld [vmem:[#allocation17_spill] sm:$0xff]  ;;  %v4445_v38 = vld [vmem:[#allocation16_spill] sm:$0xff] }
 0x12d   :  { %v1064_v33 = vadd.f32 %v968_v9, %v952_v42  ;;  %v667_v3 = vadd.f32 %v3824_v39, %v3527_v28  ;;  %v4443_v55 = vpack.c.bf16 %v4441_v31, %v4442_v8  ;;  %v4446_v12 = vpack.c.bf16 %v4444_v29, %v4445_v38  ;;  %v4447_v17 = vld [vmem:[#allocation19_spill] sm:$0xff]  ;;  %v4448_v16 = vld [vmem:[#allocation18_spill] sm:$0xff]  ;;  %v4450_v39 = vld [vmem:[#allocation21_spill] sm:$0xff] }
 0x12e   :  { %v1254_v44 = vmul.f32 0.0625, %v1161_v25  ;;  %v1256_v56 = vmul.f32 0.0625, %v1175_v22  ;;  %v969_v41 = vmax.f32 %v663_v32, 0.0  ;;  %v750_v42 = vadd.f32 %v3816_v18, %v3577_v48  ;;  %v3916_v24 = vpop.f32.mrb[28].mxu0  ;;  %v4456_v29 = vld [vmem:[#allocation25_spill] sm:$0xff]  ;;  %v4457_v38 = vld [vmem:[#allocation24_spill] sm:$0xff] }
 0x12f   :  { %2649 = vmatpush3.bf16.msra.mxu0 %v4443_v55  ;;  %2681 = vmatpush3.bf16.msra.mxu1 %v4446_v12  ;;  %v4449_v36 = vpack.c.bf16 %v4447_v17, %v4448_v16  ;;  %v4452_v21 = vpack.c.bf16 %v4450_v39, %v4451_v27  ;;  %v1065_v40 = vrot.slane %v1064_v33, 4  ;;  %v955_v26 = vmax.f32 %v746_v57, 0.0  ;;  %v3920_v32 = vpop.f32.mrb[29].mxu0  ;;  %v3922_v31 = vpop.f32.mrb[28].mxu1  ;;  %v4463_v17 = vld [vmem:[#allocation28_spill] sm:$0xff] }
 0x130   :  { %v984_v7 = vmax.f32 %v667_v3, 0.0  ;;  %v669_v35 = vadd.f32 %v3827_v23, %v3552_v0  ;;  %v1566_v9 = vsel %vm1560_vm1, %v1254_v44, %v1238_v14  ;;  %v1568_v18 = vsel %vm1560_vm1, %v1256_v56, %v1240_v30  ;;  %v3928_v55 = vpop.f32.mrb[29].mxu1  ;;  %v4453_v14 = vld [vmem:[#allocation23_spill] sm:$0xff]  ;;  %v4454_v30 = vld [vmem:[#allocation22_spill] sm:$0xff] }
 0x131   :  { %2651 = vmatprep.subr.bf16.mxu0 %v4449_v36  ;;  %2683 = vmatprep.subr.bf16.mxu1 %v4452_v21  ;;  %v1071_v25 = vadd.f32 %v969_v41, %v953_v47  ;;  %v970_v22 = vmax.f32 %v750_v42, 0.0  ;;  %v1066_v8 = vadd.f32 %v1065_v40, %v1064_v33  ;;  %v752_v3 = vadd.f32 %v3820_v61, %v4440_v46  ;;  %v4459_v41 = vld [vmem:[#allocation27_spill] sm:$0xff]  ;;  %v4462_v42 = vld [vmem:[#allocation29_spill] sm:$0xff] }
 0x132   :  { %1797 = vmatprep.mubr.f32.mxu0 %v1566_v9  ;;  %1867 = vmatprep.mubr.f32.mxu1 %v1568_v18  ;;  %v985_v57 = vmax.f32 %v669_v35, 0.0  ;;  %v673_v23 = vadd.f32 %v3840_v15, %v3527_v28  ;;  %v4455_v47 = vpack.c.bf16 %v4453_v14, %v4454_v30  ;;  %v4458_v12 = vpack.c.bf16 %v4456_v29, %v4457_v38  ;;  %v4460_v28 = vld [vmem:[#allocation26_spill] sm:$0xff]  ;;  %v3948_v21 = vpop.f32.mrb[30].mxu0  ;;  %v4465_v30 = vld [vmem:[#allocation31_spill] sm:$0xff]  ;;  %v4468_v29 = vld [vmem:[#allocation33_spill] sm:$0xff] }
 0x133   :  { %v1072_v44 = vrot.slane %v1071_v25, 4  ;;  %v1078_v56 = vadd.f32 %v970_v22, %v954_v10  ;;  %v756_v33 = vadd.f32 %v3829_v63, %v3577_v48  ;;  %v675_v61 = vadd.f32 %v3842_v62, %v3552_v0  ;;  %v3951_v35 = vpop.f32.mrb[31].mxu0  ;;  %v3953_v9 = vpop.f32.mrb[30].mxu1  ;;  %v4469_v38 = vld [vmem:[#allocation32_spill] sm:$0xff] }
 0x134   :  { %2653 = vmatpush3.bf16.msra.mxu0 %v4455_v47  ;;  %2685 = vmatpush3.bf16.msra.mxu1 %v4458_v12  ;;  %v4461_v15 = vpack.c.bf16 %v4459_v41, %v4460_v28  ;;  %v4464_v16 = vpack.c.bf16 %v4462_v42, %v4463_v17  ;;  %v1067_v36 = vrot.slane %v1066_v8, 2  ;;  %v971_v39 = vmax.f32 %v752_v3, 0.0  ;;  %v4471_v41 = vld [vmem:[#allocation35_spill] sm:$0xff]  ;;  %v4475_v28 = vld [vmem:[#allocation36_spill] sm:$0xff] }
 0x135   :  { %v1000_v27 = vmax.f32 %v673_v23, 0.0  ;;  %v758_v10 = vadd.f32 %v3834_v45, %v4440_v46  ;;  %v1153_v63 = vrot.slane %v3848_v54, 1  ;;  %v1073_v40 = vadd.f32 %v1072_v44, %v1071_v25  ;;  %v3957_v23 = vpop.f32.mrb[31].mxu1  ;;  %v4466_v45 = vld [vmem:[#allocation30_spill] sm:$0xff] }
 0x136   :  { %2655 = vmatprep.subr.bf16.mxu0 %v4461_v15  ;;  %2687 = vmatprep.subr.bf16.mxu1 %v4464_v16  ;;  %v1079_v62 = vrot.slane %v1078_v56, 4  ;;  %v1001_v0 = vmax.f32 %v675_v61, 0.0  ;;  %v3955_v18 = vadd.f32 %v1067_v36, %v1066_v8  ;;  %v1085_v22 = vadd.f32 %v971_v39, %v955_v26  ;;  %v4472_v26 = vld [vmem:[#allocation34_spill] sm:$0xff] }
 0x137   :  { %v1176_v14 = vadd.f32 %v1000_v27, %v984_v7  ;;  %v986_v3 = vmax.f32 %v756_v33, 0.0  ;;  %v4467_v47 = vpack.c.bf16 %v4465_v30, %v4466_v45  ;;  %v4470_v25 = vpack.c.bf16 %v4468_v29, %v4469_v38  ;;  %v4474_v33 = vld [vmem:[#allocation37_spill] sm:$0xff]  ;;  %v4479_v29 = vld [vmem:[#allocation38_spill] sm:$0xff] }
 0x138   :  { %v1074_v12 = vrot.slane %v1073_v40, 2  ;;  %v1080_v44 = vadd.f32 %v1079_v62, %v1078_v56  ;;  %v1183_v61 = vadd.f32 %v1001_v0, %v985_v57  ;;  %v762_v8 = vadd.f32 %v3844_v59, %v3577_v48 }
 0x139   :  { %2657 = vmatpush3.bf16.msra.mxu0 %v4467_v47  ;;  %2689 = vmatpush3.bf16.msra.mxu1 %v4470_v25  ;;  %v4473_v7 = vpack.c.bf16 %v4471_v41, %v4472_v26  ;;  %v4476_v15 = vpack.c.bf16 %v4474_v33, %v4475_v28  ;;  %v1086_v42 = vrot.slane %v1085_v22, 4  ;;  %v1177_v17 = vrot.slane %v1176_v14, 4  ;;  %v4478_v47 = vld [vmem:[#allocation39_spill] sm:$0xff]  ;;  %v4482_v25 = vld [vmem:[#allocation40_spill] sm:$0xff] }
 0x13a   :  { %v987_v16 = vmax.f32 %v758_v10, 0.0  ;;  %v764_v36 = vadd.f32 %v3846_v2, %v4440_v46  ;;  %v1075_v39 = vadd.f32 %v1074_v12, %v1073_v40  ;;  %v1081_v56 = vrot.slane %v1080_v44, 2  ;;  %v4481_v10 = vld [vmem:[#allocation41_spill] sm:$0xff]  ;;  %v4485_v12 = vld [vmem:[#allocation42_spill] sm:$0xff] }
 0x13b   :  { %2659 = vmatprep.subr.bf16.mxu0 %v4473_v7  ;;  %2691 = vmatprep.subr.bf16.mxu1 %v4476_v15  ;;  %v1184_v57 = vrot.slane %v1183_v61, 4  ;;  %v1002_v27 = vmax.f32 %v762_v8, 0.0  ;;  %v1087_v62 = vadd.f32 %v1086_v42, %v1085_v22  ;;  %v1178_v48 = vadd.f32 %v1177_v17, %v1176_v14  ;;  %v4484_v14 = vld [vmem:[#allocation43_spill] sm:$0xff] }
 0x13c   :  { %v1003_v59 = vmax.f32 %v764_v36, 0.0  ;;  %v4477_v0 = vrot.slane %v3810_v6, 1  ;;  %v1167_v45 = vrot.slane %v3852_v37, 1  ;;  %v4480_v38 = vpack.c.bf16 %v4478_v47, %v4479_v29 }
 0x13d   :  { %v4483_v2 = vpack.c.bf16 %v4481_v10, %v4482_v25  ;;  %v3985_v46 = vadd.f32 %v1081_v56, %v1080_v44  ;;  %v1185_v40 = vadd.f32 %v1184_v57, %v1183_v61  ;;  %v1190_v22 = vadd.f32 %v1002_v27, %v986_v3 }
 0x13e   :  { %v1042_v30 = vadd.f32 %v4477_v0, %v3810_v6  ;;  %2661 = vmatpush3.bf16.msra.mxu0 %v4480_v38  ;;  %v4486_v8 = vpack.c.bf16 %v4484_v14, %v4485_v12  ;;  %v4487_v6 = vpack.c.bf16 %v3480_v53, %v3478_v1  ;;  %v1088_v41 = vrot.slane %v1087_v62, 2  ;;  %v4489_v53 = vld [vmem:[#allocation45_spill] sm:$0xff]  ;;  %v4490_v1 = vld [vmem:[#allocation44_spill] sm:$0xff] }
 0x13f   :  { %2693 = vmatpush3.bf16.msra.mxu1 %v4483_v2  ;;  %v1179_v26 = vrot.slane %v1178_v48, 2  ;;  %v1197_v7 = vadd.f32 %v1003_v59, %v987_v16  ;;  %v1154_v33 = vadd.f32 %v1153_v63, %v3848_v54  ;;  %v1186_v28 = vrot.slane %v1185_v40, 2  ;;  %v4494_v59 = vld [vmem:[#allocation46_spill] sm:$0xff]  ;;  %v4497_v12 = vld [vmem:[#allocation49_spill] sm:$0xff] }
 0x140   :  { %2663 = vmatprep.subr.bf16.mxu0 %v4486_v8  ;;  %2695 = vmatprep.subr.bf16.mxu1 %v4487_v6  ;;  %v1191_v15 = vrot.slane %v1190_v22, 4  ;;  %v1237_v42 = vmul.f32 0.0625, %v1042_v30  ;;  %v1076_v44 = vrot.slane %v1075_v39, 1  ;;  %v1089_v17 = vadd.f32 %v1088_v41, %v1087_v62  ;;  %v4500_v8 = vld [vmem:[#allocation51_spill] sm:$0xff]  ;;  %v4501_v6 = vld [vmem:[#allocation50_spill] sm:$0xff] }
 0x141   :  { %v3994_v61 = vadd.f32 %v1179_v26, %v1178_v48  ;;  %v1198_v3 = vrot.slane %v1197_v7, 4  ;;  %v1253_v36 = vmul.f32 0.0625, %v1154_v33  ;;  %v4488_v56 = vpack.c.bf16 %v3484_v51, %v3482_v52  ;;  %v4493_v48 = vld [vmem:[#allocation47_spill] sm:$0xff] }
 0x142   :  { %v4491_v57 = vpack.c.bf16 %v4489_v53, %v4490_v1  ;;  %v1187_v16 = vadd.f32 %v1186_v28, %v1185_v40  ;;  %v1192_v27 = vadd.f32 %v1191_v15, %v1190_v22  ;;  %v4492_v54 = vrot.slane %v3818_v19, 1  ;;  %v4505_v28 = vld [vmem:[#allocation52_spill] sm:$0xff] }
 0x143   :  { %2665 = vmatpush3.bf16.msra.mxu0 %v4488_v56  ;;  %v1069_v62 = vrot.slane %v3955_v18, 1  ;;  %v4495_v0 = vpack.c.bf16 %v4493_v48, %v4494_v59  ;;  %v4496_v51 = vpack.c.bf16 %v3504_v4, %v3502_v5  ;;  %v1199_v52 = vadd.f32 %v1198_v3, %v1197_v7  ;;  %v4498_v4 = vld [vmem:[#allocation48_spill] sm:$0xff]  ;;  %v4511_v59 = vld [vmem:[#allocation57_spill] sm:$0xff] }
 0x144   :  { %2697 = vmatpush3.bf16.msra.mxu1 %v4491_v57  ;;  %v1056_v63 = vadd.f32 %v4492_v54, %v3818_v19  ;;  %v1565_v30 = vsel %vm1560_vm1, %v1253_v36, %v1237_v42  ;;  %v1168_v47 = vadd.f32 %v1167_v45, %v3852_v37  ;;  %v1193_v29 = vrot.slane %v1192_v27, 2  ;;  %v4507_v42 = vld [vmem:[#allocation55_spill] sm:$0xff] }
 0x145   :  { %2667 = vmatprep.subr.bf16.mxu0 %v4495_v0  ;;  %2699 = vmatprep.subr.bf16.mxu1 %v4496_v51  ;;  %v1077_v10 = vadd.f32 %v1076_v44, %v1075_v39  ;;  %v1188_v25 = vrot.slane %v1187_v16, 1  ;;  %v1200_v19 = vrot.slane %v1199_v52, 2  ;;  %v833_v40 = vadd.f32 %v3858_v34, %v3697_v58  ;;  %v4503_v39 = vld [vmem:[#allocation99_spill] sm:$0xff]  ;;  %v4504_v34 = vld [vmem:[#allocation53_spill] sm:$0xff]  ;;  %v4508_v44 = vld [vmem:[#allocation54_spill] sm:$0xff] }
 0x146   :  { %v1239_v38 = vmul.f32 0.0625, %v1056_v63  ;;  %v1255_v2 = vmul.f32 0.0625, %v1168_v47  ;;  %v1090_v22 = vrot.slane %v1089_v17, 1  ;;  %v4016_v14 = vadd.f32 %v1193_v29, %v1192_v27  ;;  %v4510_v54 = vld [vmem:[#allocation103_spill] sm:$0xff]  ;;  %v4512_v0 = vld [vmem:[#allocation56_spill] sm:$0xff] }
 0x147   :  { %v4499_v5 = vpack.c.bf16 %v4497_v12, %v4498_v4  ;;  %v4502_v41 = vpack.c.bf16 %v4500_v8, %v4501_v6  ;;  %v1189_v37 = vadd.f32 %v1188_v25, %v1187_v16  ;;  %v1242_v45 = vmul.f32 0.0625, %v1077_v10  ;;  %v4518_v25 = vld [vmem:[#allocation61_spill] sm:$0xff] }
 0x148   :  { %v835_v26 = vadd.f32 %v3862_v20, %v4503_v39  ;;  %v1083_v7 = vrot.slane %v3985_v46, 1  ;;  %v1201_v33 = vadd.f32 %v1200_v19, %v1199_v52  ;;  %v4506_v15 = vpack.c.bf16 %v4504_v34, %v4505_v28  ;;  %v4514_v52 = vld [vmem:[#allocation59_spill] sm:$0xff]  ;;  %v4519_v19 = vld [vmem:[#allocation60_spill] sm:$0xff] }
 0x149   :  { %2669 = vmatpush3.bf16.msra.mxu0 %v4499_v5  ;;  %2701 = vmatpush3.bf16.msra.mxu1 %v4502_v41  ;;  %v4509_v3 = vpack.c.bf16 %v4507_v42, %v4508_v44  ;;  %v1567_v36 = vsel %vm1560_vm1, %v1255_v2, %v1239_v38  ;;  %v1091_v56 = vadd.f32 %v1090_v22, %v1089_v17  ;;  %v1258_v53 = vmul.f32 0.0625, %v1189_v37  ;;  %v4515_v17 = vld [vmem:[#allocation58_spill] sm:$0xff]  ;;  %v4521_v2 = vld [vmem:[#allocation63_spill] sm:$0xff]  ;;  %v4525_v28 = vld [vmem:[#allocation64_spill] sm:$0xff] }
 0x14a   :  { %2671 = vmatprep.subr.bf16.mxu0 %v4506_v15  ;;  %v956_v1 = vmax.f32 %v833_v40, 0.0  ;;  %v957_v57 = vmax.f32 %v835_v26, 0.0  ;;  %v839_v20 = vadd.f32 %v3886_v13, %v3697_v58  ;;  %v1202_v16 = vrot.slane %v1201_v33, 1  ;;  %v4517_v13 = vld [vmem:[#allocation109_spill] sm:$0xff]  ;;  %v4522_v40 = vld [vmem:[#allocation62_spill] sm:$0xff]  ;;  %v4527_v42 = vld [vmem:[#allocation67_spill] sm:$0xff] }
 0x14b   :  { %2703 = vmatprep.subr.bf16.mxu1 %v4509_v3  ;;  %v1244_v27 = vmul.f32 0.0625, %v1091_v56  ;;  %v922_v63 = vadd.f32 %v3864_v11, %v4510_v54  ;;  %v841_v48 = vadd.f32 %v3890_v43, %v4503_v39  ;;  %v4513_v51 = vpack.c.bf16 %v4511_v59, %v4512_v0 }
 0x14c   :  { %v4516_v47 = vpack.c.bf16 %v4514_v52, %v4515_v17  ;;  %v1570_v29 = vsel %vm1560_vm1, %v1258_v53, %v1242_v45  ;;  %v972_v38 = vmax.f32 %v839_v20, 0.0  ;;  %v924_v10 = vadd.f32 %v3872_v49, %v4517_v13  ;;  %v4531_v53 = vld [vmem:[#allocation68_spill] sm:$0xff] }
 0x14d   :  { %2673 = vmatpush3.bf16.msra.mxu0 %v4513_v51  ;;  %v845_v11 = vadd.f32 %v3916_v24, %v3697_v58  ;;  %v4520_v43 = vpack.c.bf16 %v4518_v25, %v4519_v19  ;;  %v4523_v22 = vpack.c.bf16 %v4521_v2, %v4522_v40  ;;  %v1203_v12 = vadd.f32 %v1202_v16, %v1201_v33  ;;  %v4524_v33 = vld [vmem:[#allocation65_spill] sm:$0xff]  ;;  %v4540_v25 = vld [vmem:[#allocation75_spill] sm:$0xff]  ;;  %v4542_v40 = vld [vmem:[#allocation78_spill] sm:$0xff] }
 0x14e   :  { %2705 = vmatpush3.bf16.msra.mxu1 %v4516_v47  ;;  %v958_v4 = vmax.f32 %v922_v63, 0.0  ;;  %v973_v5 = vmax.f32 %v841_v48, 0.0  ;;  %v928_v8 = vadd.f32 %v3892_v50, %v4510_v54  ;;  %v1092_v6 = vadd.f32 %v972_v38, %v956_v1  ;;  %v4528_v50 = vld [vmem:[#allocation66_spill] sm:$0xff] }
 0x14f   :  { %2707 = vmatprep.subr.bf16.mxu0 %v4520_v43  ;;  %2739 = vmatprep.subr.bf16.mxu1 %v4523_v22  ;;  %v959_v41 = vmax.f32 %v924_v10, 0.0  ;;  %v988_v49 = vmax.f32 %v845_v11, 0.0  ;;  %v847_v24 = vadd.f32 %v3920_v32, %v4503_v39  ;;  %v1260_v37 = vmul.f32 0.0625, %v1203_v12  ;;  %v4536_v38 = vld [vmem:[#allocation74_spill] sm:$0xff]  ;;  %v4537_v10 = vld [vmem:[#allocation73_spill] sm:$0xff]  ;;  %v4539_v11 = vld [vmem:[#allocation76_spill] sm:$0xff] }
 0x150   :  { %1798 = vmatmul.mubr.f32.vlgmr.msra.gmra.mrb[34].mxu0 %v1565_v30  ;;  %v1099_v45 = vadd.f32 %v973_v5, %v957_v57  ;;  %v974_v26 = vmax.f32 %v928_v8, 0.0  ;;  %v930_v34 = vadd.f32 %v3898_v60, %v4517_v13  ;;  %v4526_v15 = vpack.c.bf16 %v4524_v33, %v4525_v28  ;;  %v4533_v60 = vld [vmem:[#allocation72_spill] sm:$0xff]  ;;  %v4534_v57 = vld [vmem:[#allocation71_spill] sm:$0xff]  ;;  %v4543_v22 = vld [vmem:[#allocation77_spill] sm:$0xff] }
 0x151   :  { %1868 = vmatmul.mubr.f32.vlgmr.msra.gmra.mrb[34].mxu1 %v1567_v36  ;;  %v4529_v44 = vpack.c.bf16 %v4527_v42, %v4528_v50  ;;  %v1093_v3 = vrot.slane %v1092_v6, 4  ;;  %v989_v56 = vmax.f32 %v847_v24, 0.0  ;;  %v851_v32 = vadd.f32 %v3948_v21, %v3697_v58  ;;  %v4530_v36 = vld [vmem:[#allocation69_spill] sm:$0xff]  ;;  %1937 = vmatprep.mubr.f32.mxu0 %v1570_v29  ;;  %v4548_v33 = vld [vmem:[#allocation82_spill] sm:$0xff]  ;;  %v4551_v42 = vld [vmem:[#allocation84_spill] sm:$0xff] }
 0x152   :  { %2709 = vmatpush3.bf16.msra.mxu0 %v4526_v15  ;;  %v934_v30 = vadd.f32 %v3922_v31, %v4510_v54  ;;  %v4532_v1 = vpack.c.bf16 %v4530_v36, %v4531_v53  ;;  %v4535_v20 = vpack.c.bf16 %v4533_v60, %v4534_v57  ;;  %v1572_v16 = vsel %vm1560_vm1, %v1260_v37, %v1244_v27  ;;  %v4549_v28 = vld [vmem:[#allocation81_spill] sm:$0xff]  ;;  %v4552_v50 = vld [vmem:[#allocation83_spill] sm:$0xff]  ;;  %v4554_v36 = vld [vmem:[#allocation86_spill] sm:$0xff] }
 0x153   :  { %2741 = vmatpush3.bf16.msra.mxu1 %v4529_v44  ;;  %v1100_v63 = vrot.slane %v1099_v45, 4  ;;  %v1106_v48 = vadd.f32 %v974_v26, %v958_v4  ;;  %v975_v59 = vmax.f32 %v930_v34, 0.0  ;;  %2007 = vmatprep.mubr.f32.mxu1 %v1572_v16  ;;  %v1094_v0 = vadd.f32 %v1093_v3, %v1092_v6  ;;  %v4546_v4 = vld [vmem:[#allocation79_spill] sm:$0xff]  ;;  %v4555_v53 = vld [vmem:[#allocation85_spill] sm:$0xff]  ;;  %v4557_v60 = vld [vmem:[#allocation88_spill] sm:$0xff] }
 0x154   :  { %2711 = vmatprep.subr.bf16.mxu0 %v4532_v1  ;;  %2743 = vmatprep.subr.bf16.mxu1 %v4535_v20  ;;  %v1004_v58 = vmax.f32 %v851_v32, 0.0  ;;  %v990_v21 = vmax.f32 %v934_v30, 0.0  ;;  %v853_v31 = vadd.f32 %v3951_v35, %v4503_v39  ;;  %v936_v47 = vadd.f32 %v3928_v55, %v4517_v13  ;;  %v4545_v55 = vld [vmem:[#allocation80_spill] sm:$0xff]  ;;  %v4558_v57 = vld [vmem:[#allocation87_spill] sm:$0xff] }
 0x155   :  { %v1101_v51 = vadd.f32 %v1100_v63, %v1099_v45  ;;  %v1107_v52 = vrot.slane %v1106_v48, 4  ;;  %v1113_v17 = vadd.f32 %v975_v59, %v959_v41  ;;  %v4538_v27 = vpack.c.bf16 %v4536_v38, %v4537_v10  ;;  %v4560_v10 = vld [vmem:[#allocation90_spill] sm:$0xff] }
 0x156   :  { %v4541_v29 = vpack.c.bf16 %v4539_v11, %v4540_v25  ;;  %v1095_v19 = vrot.slane %v1094_v0, 2  ;;  %v1204_v43 = vadd.f32 %v1004_v58, %v988_v49  ;;  %v1005_v2 = vmax.f32 %v853_v31, 0.0  ;;  %v4563_v11 = vld [vmem:[#allocation92_spill] sm:$0xff]  ;;  %v4564_v25 = vld [vmem:[#allocation91_spill] sm:$0xff] }
 0x157   :  { %2713 = vmatpush3.bf16.msra.mxu0 %v4538_v27  ;;  %v940_v35 = vadd.f32 %v3953_v9, %v4510_v54  ;;  %v1181_v39 = vrot.slane %v3994_v61, 1  ;;  %v4544_v12 = vpack.c.bf16 %v4542_v40, %v4543_v22  ;;  %v4547_v5 = vpack.c.bf16 %v4545_v55, %v4546_v4  ;;  %v4570_v40 = vld [vmem:[#allocation95_spill] sm:$0xff] }
 0x158   :  { %2745 = vmatpush3.bf16.msra.mxu1 %v4541_v29  ;;  %v1102_v8 = vrot.slane %v1101_v51, 2  ;;  %v1108_v6 = vadd.f32 %v1107_v52, %v1106_v48  ;;  %v1114_v41 = vrot.slane %v1113_v17, 4  ;;  %v1195_v24 = vrot.slane %v4016_v14, 1 }
 0x159   :  { %2715 = vmatprep.subr.bf16.mxu0 %v4544_v12  ;;  %2747 = vmatprep.subr.bf16.mxu1 %v4547_v5  ;;  %v1205_v49 = vrot.slane %v1204_v43, 4  ;;  %v1211_v37 = vadd.f32 %v1005_v2, %v989_v56  ;;  %v1006_v45 = vmax.f32 %v940_v35, 0.0  ;;  %v991_v54 = vmax.f32 %v936_v47, 0.0  ;;  %v1454_v47 = vld [vmem:[#allocation2 + $0x5e8] sm:$0xff] }
 0x15a   :  { %v1109_v26 = vrot.slane %v1108_v6, 2  ;;  %v1115_v9 = vadd.f32 %v1114_v41, %v1113_v17  ;;  %v942_v34 = vadd.f32 %v3957_v23, %v4517_v13  ;;  %v4550_v15 = vpack.c.bf16 %v4548_v33, %v4549_v28  ;;  %v1453_v17 = vld [vmem:[#allocation2 + $0x5e0] sm:$0xff]  ;;  %v4567_v2 = vld [vmem:[#allocation93_spill] sm:$0xff]  ;;  %v4572_v28 = vld [vmem:[#allocation98_spill] sm:$0xff] }
 0x15b   :  { %v4553_v44 = vpack.c.bf16 %v4551_v42, %v4552_v50  ;;  %v4108_v3 = vadd.f32 %v1095_v19, %v1094_v0  ;;  %v1206_v32 = vadd.f32 %v1205_v49, %v1204_v43  ;;  %v1212_v30 = vrot.slane %v1211_v37, 4  ;;  %v1437_v50 = vld [vmem:[#allocation2 + $0x560] sm:$0xff] }
 0x15c   :  { %2717 = vmatpush3.bf16.msra.mxu0 %v4550_v15  ;;  %v1218_v56 = vadd.f32 %v1006_v45, %v990_v21  ;;  %v4556_v1 = vpack.c.bf16 %v4554_v36, %v4555_v53  ;;  %v4559_v23 = vpack.c.bf16 %v4557_v60, %v4558_v57  ;;  %v1103_v13 = vadd.f32 %v1102_v8, %v1101_v51  ;;  %v4561_v51 = vld [vmem:[#allocation89_spill] sm:$0xff]  ;;  %v1405_v45 = vld [vmem:[#allocation2 + $0x460] sm:$0xff]  ;;  %v4581_v57 = vld [vmem:[#allocation106_spill] sm:$0xff] }
 0x15d   :  { %2749 = vmatpush3.bf16.msra.mxu1 %v4553_v44  ;;  %v1116_v20 = vrot.slane %v1115_v9, 2  ;;  %v1007_v16 = vmax.f32 %v942_v34, 0.0  ;;  %v1070_v63 = vadd.f32 %v1069_v62, %v3955_v18  ;;  %v1207_v48 = vrot.slane %v1206_v32, 2  ;;  %v4573_v15 = vld [vmem:[#allocation97_spill] sm:$0xff]  ;;  %v4578_v53 = vld [vmem:[#allocation104_spill] sm:$0xff] }
 0x15e   :  { %2719 = vmatprep.subr.bf16.mxu0 %v4556_v1  ;;  %2751 = vmatprep.subr.bf16.mxu1 %v4559_v23  ;;  %v1213_v59 = vadd.f32 %v1212_v30, %v1211_v37  ;;  %v1219_v0 = vrot.slane %v1218_v56, 4  ;;  %v1182_v58 = vadd.f32 %v1181_v39, %v3994_v61  ;;  %v4120_v21 = vadd.f32 %v1109_v26, %v1108_v6  ;;  %v4566_v61 = vld [vmem:[#allocation94_spill] sm:$0xff]  ;;  %v4569_v39 = vld [vmem:[#allocation96_spill] sm:$0xff]  ;;  %v4582_v23 = vld [vmem:[#allocation105_spill] sm:$0xff] }
 0x15f   :  { %v1117_v31 = vadd.f32 %v1116_v20, %v1115_v9  ;;  %v1225_v52 = vadd.f32 %v1007_v16, %v991_v54  ;;  %v1241_v38 = vmul.f32 0.0625, %v1070_v63  ;;  %v4562_v27 = vpack.c.bf16 %v4560_v10, %v4561_v51  ;;  %v1406_v26 = vld [vmem:[#allocation2 + $0x468] sm:$0xff]  ;;  %v4579_v1 = vld [vmem:[#allocation102_spill] sm:$0xff] }
 0x160   :  { %v4565_v29 = vpack.c.bf16 %v4563_v11, %v4564_v25  ;;  %v1208_v18 = vadd.f32 %v1207_v48, %v1206_v32  ;;  %v1214_v62 = vrot.slane %v1213_v59, 2  ;;  %v1220_v19 = vadd.f32 %v1219_v0, %v1218_v56  ;;  %v1438_v44 = vld [vmem:[#allocation2 + $0x568] sm:$0xff]  ;;  %v1423_v32 = vld [vmem:[#allocation2 + $0x4f0] sm:$0xff]  ;;  %v1424_v63 = vld [vmem:[#allocation2 + $0x4f8] sm:$0xff] }
 0x161   :  { %2721 = vmatpush3.bf16.msra.mxu0 %v4562_v27  ;;  %v1257_v43 = vmul.f32 0.0625, %v1182_v58  ;;  %v4568_v35 = vpack.c.bf16 %v4566_v61, %v4567_v2  ;;  %v4571_v22 = vpack.c.bf16 %v4569_v39, %v4570_v40  ;;  %v1226_v12 = vrot.slane %v1225_v52, 4  ;;  %v1455_v48 = vld [vmem:[#allocation2 + $0x5f0] sm:$0xff]  ;;  %v4584_v27 = vld [vmem:[#allocation108_spill] sm:$0xff]  ;;  %v4585_v11 = vld [vmem:[#allocation107_spill] sm:$0xff] }
 0x162   :  { %2753 = vmatpush3.bf16.msra.mxu1 %v4565_v29  ;;  %v1084_v55 = vadd.f32 %v1083_v7, %v3985_v46  ;;  %v1196_v4 = vadd.f32 %v1195_v24, %v4016_v14  ;;  %v1104_v5 = vrot.slane %v1103_v13, 1  ;;  %v1215_v8 = vadd.f32 %v1214_v62, %v1213_v59  ;;  %v4575_v14 = vld [vmem:[#allocation101_spill] sm:$0xff]  ;;  %v4576_v7 = vld [vmem:[#allocation100_spill] sm:$0xff]  ;;  %v1456_v59 = vld [vmem:[#allocation2 + $0x5f8] sm:$0xff] }
 0x163   :  { %2723 = vmatprep.subr.bf16.mxu0 %v4568_v35  ;;  %2755 = vmatprep.subr.bf16.mxu1 %v4571_v22  ;;  %v1221_v6 = vrot.slane %v1220_v19, 2  ;;  %v2762_v41 = vpack.c.bf16 %v1454_v47, %v1453_v17  ;;  %v4139_v49 = vsel %vm1560_vm1, %v1257_v43, %v1241_v38  ;;  %v1227_v37 = vadd.f32 %v1226_v12, %v1225_v52  ;;  %v4587_v29 = vld [vmem:[#allocation111_spill] sm:$0xff]  ;;  %v4588_v62 = vld [vmem:[#allocation110_spill] sm:$0xff]  ;;  %v4591_v12 = vld [vmem:[#allocation112_spill] sm:$0xff] }
 0x164   :  { %v1243_v9 = vmul.f32 0.0625, %v1084_v55  ;;  %v1259_v54 = vmul.f32 0.0625, %v1196_v4  ;;  %v1105_v34 = vadd.f32 %v1104_v5, %v1103_v13  ;;  %v1097_v33 = vrot.slane %v4108_v3, 1  ;;  %v1407_v2 = vld [vmem:[#allocation2 + $0x470] sm:$0xff]  ;;  %v1408_v35 = vld [vmem:[#allocation2 + $0x478] sm:$0xff]  ;;  %v1473_v5 = vld [vmem:[#allocation2 + $0x680] sm:$0xff] }
 0x165   :  { %v4574_v46 = vpack.c.bf16 %v4572_v28, %v4573_v15  ;;  %v4577_v24 = vpack.c.bf16 %v4575_v14, %v4576_v7  ;;  %v1222_v42 = vadd.f32 %v1221_v6, %v1220_v19  ;;  %v1216_v30 = vrot.slane %v1215_v8, 1  ;;  %v1439_v39 = vld [vmem:[#allocation2 + $0x570] sm:$0xff]  ;;  %v1440_v4 = vld [vmem:[#allocation2 + $0x578] sm:$0xff] }
 0x166   :  { %v1118_v56 = vrot.slane %v1117_v31, 1  ;;  %v1111_v36 = vrot.slane %v4120_v21, 1  ;;  %v4580_v60 = vpack.c.bf16 %v4578_v53, %v4579_v1  ;;  %v4583_v13 = vpack.c.bf16 %v4581_v57, %v4582_v23  ;;  %v1476_v53 = vld [vmem:[#allocation2 + $0x698] sm:$0xff]  ;;  %v1507_v1 = vld [vmem:[#allocation2 + $0x790] sm:$0xff] }
 0x167   :  { %2725 = vmatpush3.bf16.msra.mxu0 %v4574_v46  ;;  %2757 = vmatpush3.bf16.msra.mxu1 %v4577_v24  ;;  %v1209_v20 = vrot.slane %v1208_v18, 1  ;;  %v1228_v16 = vrot.slane %v1227_v37, 2  ;;  %v4156_v0 = vsel %vm1560_vm1, %v1259_v54, %v1243_v9  ;;  %v1223_v58 = vrot.slane %v1222_v42, 1  ;;  %v1505_v9 = vld [vmem:[#allocation2 + $0x780] sm:$0xff]  ;;  %v1506_v54 = vld [vmem:[#allocation2 + $0x788] sm:$0xff] }
 0x168   :  { %2727 = vmatprep.subr.bf16.mxu0 %v4580_v60  ;;  %2759 = vmatprep.subr.bf16.mxu1 %v4583_v13  ;;  %v1217_v52 = vadd.f32 %v1216_v30, %v1215_v8  ;;  %v1246_v17 = vmul.f32 0.0625, %v1105_v34  ;;  %v1119_v47 = vadd.f32 %v1118_v56, %v1117_v31  ;;  %v2732_v10 = vpack.c.bf16 %v1406_v26, %v1405_v45  ;;  %v4590_v31 = vld [vmem:[#allocation113_spill] sm:$0xff]  ;;  %v1508_v60 = vld [vmem:[#allocation2 + $0x798] sm:$0xff] }
 0x169   :  { %v1229_v38 = vadd.f32 %v1228_v16, %v1227_v37  ;;  %v2764_v51 = vpack.c.bf16 %v1438_v44, %v1437_v50  ;;  %v4586_v25 = vpack.c.bf16 %v4584_v27, %v4585_v11  ;;  %v4589_v19 = vpack.c.bf16 %v4587_v29, %v4588_v62  ;;  %v1474_v8 = vld [vmem:[#allocation2 + $0x688] sm:$0xff]  ;;  %v1457_v50 = vld [vmem:[#allocation2 + $0x600] sm:$0xff]  ;;  %v1460_v16 = vld [vmem:[#allocation2 + $0x618] sm:$0xff] }
 0x16a   :  { %v2734_v43 = vpack.c.bf16 %v1424_v63, %v1423_v32  ;;  %v2766_v61 = vpack.c.bf16 %v1456_v59, %v1455_v48  ;;  %v1262_v40 = vmul.f32 0.0625, %v1217_v52  ;;  %v1098_v22 = vadd.f32 %v1097_v33, %v4108_v3  ;;  %v1490_v44 = vld [vmem:[#allocation2 + $0x708] sm:$0xff]  ;;  %v1475_v32 = vld [vmem:[#allocation2 + $0x690] sm:$0xff]  ;;  %v1477_v52 = vld [vmem:[#allocation2 + $0x6a0] sm:$0xff] }
 0x16b   :  { %2729 = vmatpush3.bf16.msra.mxu0 %v4586_v25  ;;  %2761 = vmatpush3.bf16.msra.mxu1 %v4589_v19  ;;  %v4592_v55 = vpack.c.bf16 %v4590_v31, %v4591_v12  ;;  %v1230_v6 = vrot.slane %v1229_v38, 1  ;;  %v1210_v37 = vadd.f32 %v1209_v20, %v1208_v18  ;;  %v1112_v45 = vadd.f32 %v1111_v36, %v4120_v21  ;;  %v1458_v18 = vld [vmem:[#allocation2 + $0x608] sm:$0xff]  ;;  %v1459_v20 = vld [vmem:[#allocation2 + $0x610] sm:$0xff]  ;;  %v1461_v27 = vld [vmem:[#allocation2 + $0x620] sm:$0xff] }
 0x16c   :  { %2763 = vmatprep.subr.bf16.mxu1 %v2762_v41  ;;  %v1224_v26 = vadd.f32 %v1223_v58, %v1222_v42  ;;  %v1574_v34 = vsel %vm1560_vm1, %v1262_v40, %v1246_v17  ;;  %v1248_v28 = vmul.f32 0.0625, %v1119_v47  ;;  %v1245_v15 = vmul.f32 0.0625, %v1098_v22  ;;  %v1489_v42 = vld [vmem:[#allocation2 + $0x700] sm:$0xff]  ;;  %v1491_v59 = vld [vmem:[#allocation2 + $0x710] sm:$0xff]  ;;  %v1492_v58 = vld [vmem:[#allocation2 + $0x718] sm:$0xff] }
 0x16d   :  { %2731 = vmatprep.subr.bf16.mxu0 %v4592_v55  ;;  %v1231_v3 = vadd.f32 %v1230_v6, %v1229_v38  ;;  %v1261_v33 = vmul.f32 0.0625, %v1210_v37  ;;  %v1247_v46 = vmul.f32 0.0625, %v1112_v45  ;;  %v2736_v41 = vpack.c.bf16 %v1408_v35, %v1407_v2  ;;  %v1478_v17 = vld [vmem:[#allocation2 + $0x6a8] sm:$0xff]  ;;  %v1509_v47 = vld [vmem:[#allocation2 + $0x7a0] sm:$0xff]  ;;  %v1511_v2 = vld [vmem:[#allocation2 + $0x7b0] sm:$0xff] }
 0x16e   :  { %v1263_v14 = vmul.f32 0.0625, %v1224_v26  ;;  %v2768_v7 = vpack.c.bf16 %v1440_v4, %v1439_v39  ;;  %v2770_v24 = vpack.c.bf16 %v1474_v8, %v1473_v5  ;;  %v2802_v21 = vpack.c.bf16 %v1506_v54, %v1505_v9  ;;  %v1510_v38 = vld [vmem:[#allocation2 + $0x7a8] sm:$0xff]  ;;  %v1493_v62 = vld [vmem:[#allocation2 + $0x720] sm:$0xff]  ;;  %v1512_v35 = vld [vmem:[#allocation2 + $0x7b8] sm:$0xff] }
 0x16f   :  { %2733 = vmatpush3.bf16.msra.mxu0 %v2732_v10  ;;  %2765 = vmatpush3.bf16.msra.mxu1 %v2764_v51  ;;  %v1264_v30 = vmul.f32 0.0625, %v1231_v3  ;;  %v4171_v56 = vsel %vm1560_vm1, %v1261_v33, %v1245_v15  ;;  %v2772_v23 = vpack.c.bf16 %v1458_v18, %v1457_v50  ;;  %v2804_v13 = vpack.c.bf16 %v1490_v44, %v1489_v42  ;;  %v1462_v11 = vld [vmem:[#allocation2 + $0x628] sm:$0xff]  ;;  %v1463_v39 = vld [vmem:[#allocation2 + $0x630] sm:$0xff]  ;;  %v1464_v40 = vld [vmem:[#allocation2 + $0x638] sm:$0xff] }
 0x170   :  { %2735 = vmatprep.subr.bf16.mxu0 %v2734_v43  ;;  %2767 = vmatprep.subr.bf16.mxu1 %v2766_v61  ;;  %v4174_v36 = vsel %vm1560_vm1, %v1263_v14, %v1247_v46  ;;  %v2774_v63 = vpack.c.bf16 %v1476_v53, %v1475_v32  ;;  %v2806_v48 = vpack.c.bf16 %v1508_v60, %v1507_v1  ;;  %v1494_v19 = vld [vmem:[#allocation2 + $0x728] sm:$0xff]  ;;  %v1479_v43 = vld [vmem:[#allocation2 + $0x6b0] sm:$0xff]  ;;  %v1480_v61 = vld [vmem:[#allocation2 + $0x6b8] sm:$0xff] }
 0x171   :  { %v1576_v57 = vsel %vm1560_vm1, %v1264_v30, %v1248_v28  ;;  %v2776_v10 = vpack.c.bf16 %v1460_v16, %v1459_v20  ;;  %v2808_v51 = vpack.c.bf16 %v1492_v58, %v1491_v59  ;;  %v2778_v25 = vpack.c.bf16 %v1478_v17, %v1477_v52  ;;  %v1495_v12 = vld [vmem:[#allocation2 + $0x730] sm:$0xff]  ;;  %v1496_v55 = vld [vmem:[#allocation2 + $0x738] sm:$0xff]  ;;  %v1481_v4 = vld [vmem:[#allocation2 + $0x6c0] sm:$0xff] }
 0x172   :  { %v2810_v29 = vpack.c.bf16 %v1510_v38, %v1509_v47  ;;  %v2782_v22 = vpack.c.bf16 %v1480_v61, %v1479_v43  ;;  %v2814_v31 = vpack.c.bf16 %v1512_v35, %v1511_v2  ;;  %v1482_v5 = vld [vmem:[#allocation2 + $0x6c8] sm:$0xff]  ;;  %v1513_v8 = vld [vmem:[#allocation2 + $0x7c0] sm:$0xff]  ;;  %v2784_v37 = vpack.c.bf16 %v1464_v40, %v1463_v39  ;;  %v1483_v3 = vld [vmem:[#allocation2 + $0x6d0] sm:$0xff] }
 0x173   :  { %2737 = vmatpush3.bf16.msra.mxu0 %v2736_v41  ;;  %2769 = vmatpush3.bf16.msra.mxu1 %v2768_v7  ;;  %v1514_v6 = vld [vmem:[#allocation2 + $0x7c8] sm:$0xff]  ;;  %v2816_v45 = vpack.c.bf16 %v1496_v55, %v1495_v12  ;;  %v1465_v26 = vld [vmem:[#allocation2 + $0x640] sm:$0xff]  ;;  %v2786_v54 = vpack.c.bf16 %v1482_v5, %v1481_v4  ;;  %v1484_v33 = vld [vmem:[#allocation2 + $0x6d8] sm:$0xff] }
 0x174   :  { %2771 = vmatprep.subr.bf16.mxu0 %v2770_v24  ;;  %2803 = vmatprep.subr.bf16.mxu1 %v2802_v21  ;;  %v1466_v9 = vld [vmem:[#allocation2 + $0x648] sm:$0xff]  ;;  %v1497_v28 = vld [vmem:[#allocation2 + $0x740] sm:$0xff]  ;;  %v1515_v46 = vld [vmem:[#allocation2 + $0x7d0] sm:$0xff]  ;;  %v2790_v18 = vpack.c.bf16 %v1484_v33, %v1483_v3 }
 0x175   :  { %v1498_v15 = vld [vmem:[#allocation2 + $0x748] sm:$0xff]  ;;  %v1516_v14 = vld [vmem:[#allocation2 + $0x7d8] sm:$0xff]  ;;  %v2788_v41 = vpack.c.bf16 %v1466_v9, %v1465_v26  ;;  %v1467_v24 = vld [vmem:[#allocation2 + $0x650] sm:$0xff] }
 0x176   :  { %1938 = vmatmul.mubr.f32.vlgmr.msra.gmra.mrb[36].mxu0 %v4139_v49  ;;  %2008 = vmatmul.mubr.f32.vlgmr.msra.gmra.mrb[36].mxu1 %v4156_v0  ;;  %v2780_v49 = vpack.c.bf16 %v1462_v11, %v1461_v27  ;;  %v2812_v0 = vpack.c.bf16 %v1494_v19, %v1493_v62  ;;  %v2820_v7 = vpack.c.bf16 %v1498_v15, %v1497_v28  ;;  %v1468_v50 = vld [vmem:[#allocation2 + $0x658] sm:$0xff]  ;;  %v1499_v42 = vld [vmem:[#allocation2 + $0x750] sm:$0xff]  ;;  %v1485_v32 = vld [vmem:[#allocation2 + $0x6e0] sm:$0xff] }
 0x177   :  { %2773 = vmatpush3.bf16.msra.mxu0 %v2772_v23  ;;  %2805 = vmatpush3.bf16.msra.mxu1 %v2804_v13  ;;  %v2822_v21 = vpack.c.bf16 %v1516_v14, %v1515_v46  ;;  %v1500_v44 = vld [vmem:[#allocation2 + $0x758] sm:$0xff]  ;;  %v1486_v30 = vld [vmem:[#allocation2 + $0x6e8] sm:$0xff]  ;;  %v1517_v53 = vld [vmem:[#allocation2 + $0x7e0] sm:$0xff]  ;;  %v2792_v60 = vpack.c.bf16 %v1468_v50, %v1467_v24 }
 0x178   :  { %2775 = vmatprep.subr.bf16.mxu0 %v2774_v63  ;;  %2807 = vmatprep.subr.bf16.mxu1 %v2806_v48  ;;  %v1518_v1 = vld [vmem:[#allocation2 + $0x7e8] sm:$0xff]  ;;  %v1469_v23 = vld [vmem:[#allocation2 + $0x660] sm:$0xff]  ;;  %v2794_v20 = vpack.c.bf16 %v1486_v30, %v1485_v32  ;;  %v1487_v59 = vld [vmem:[#allocation2 + $0x6f0] sm:$0xff] }
 0x179   :  { %2077 = vmatprep.mubr.f32.mxu0 %v1574_v34  ;;  %2147 = vmatprep.mubr.f32.mxu1 %v1576_v57  ;;  %v2818_v34 = vpack.c.bf16 %v1514_v6, %v1513_v8  ;;  %v2824_v57 = vpack.c.bf16 %v1500_v44, %v1499_v42  ;;  %v1470_v13 = vld [vmem:[#allocation2 + $0x668] sm:$0xff]  ;;  %v2826_v16 = vpack.c.bf16 %v1518_v1, %v1517_v53  ;;  %v1501_v63 = vld [vmem:[#allocation2 + $0x760] sm:$0xff]  ;;  %v1488_v58 = vld [vmem:[#allocation2 + $0x6f8] sm:$0xff] }
 0x17a   :  { %v1502_v48 = vld [vmem:[#allocation2 + $0x768] sm:$0xff]  ;;  %v1519_v52 = vld [vmem:[#allocation2 + $0x7f0] sm:$0xff]  ;;  %v1520_v17 = vld [vmem:[#allocation2 + $0x7f8] sm:$0xff]  ;;  %v2796_v47 = vpack.c.bf16 %v1470_v13, %v1469_v23 }
 0x17b   :  { %2777 = vmatpush3.bf16.msra.mxu0 %v2776_v10  ;;  %2809 = vmatpush3.bf16.msra.mxu1 %v2808_v51  ;;  %v2828_v38 = vpack.c.bf16 %v1502_v48, %v1501_v63  ;;  %v1471_v10 = vld [vmem:[#allocation2 + $0x670] sm:$0xff]  ;;  %v2798_v51 = vpack.c.bf16 %v1488_v58, %v1487_v59  ;;  %v2830_v27 = vpack.c.bf16 %v1520_v17, %v1519_v52  ;;  %v1472_v11 = vld [vmem:[#allocation2 + $0x678] sm:$0xff]  ;;  %v2201_v2 = vld [vmem:[%s4200_s4] ss:$0 sm:$0xff]  ;;  %s2891_s4 = smov [#allocation5]  }
 0x17c   :  { %2779 = vmatprep.subr.bf16.mxu0 %v2778_v25  ;;  %2811 = vmatprep.subr.bf16.mxu1 %v2810_v29  ;;  %v1503_v25 = vld [vmem:[#allocation2 + $0x770] sm:$0xff]  ;;  %v1504_v29 = vld [vmem:[#allocation2 + $0x778] sm:$0xff]  ;;  %v2800_v62 = vpack.c.bf16 %v1472_v11, %v1471_v10  ;;  %s2160_s24 = sshll.u32 %s2891_s4, 4  ;;  %s2161_s24 = int_to_ptr.vmem [resolvable:$true] %s2160_s24 }
 0x17d   :  { %v2832_v19 = vpack.c.bf16 %v1504_v29, %v1503_v25  ;;  %s2861_s25 = scalar_lea.vmem %s2161_s24, 32  ;;  %p2866_p9 = scmp.lt.s32.totalorder %s2161_s24, %s2161_s24 }
 0x17e   :  { %p2862_p8 = scmp.ne.s32.totalorder %s2161_s24, %s2861_s25  ;;  %p2867_p10 = scmp.lt.s32.totalorder %s2861_s25, %s2861_s25 }
 0x17f   :  { %2781 = vmatpush3.bf16.msra.mxu0 %v2780_v49  ;;  %2813 = vmatpush3.bf16.msra.mxu1 %v2812_v0 }
 0x180   :  { %2783 = vmatprep.subr.bf16.mxu0 %v2782_v22  ;;  %2815 = vmatprep.subr.bf16.mxu1 %v2814_v31  ;;  %p2868_p11 = por %p2867_p10, %p2866_p9 }
 0x182   :  { %p2869_p12 = pnand %p2868_p11, %p2862_p8 }
 0x183   :  { %2785 = vmatpush3.bf16.msra.mxu0 %v2784_v37  ;;  %2817 = vmatpush3.bf16.msra.mxu1 %v2816_v45 }
 0x184   :  { %2787 = vmatprep.subr.bf16.mxu0 %v2786_v54  ;;  %2819 = vmatprep.subr.bf16.mxu1 %v2818_v34 }
 0x187   :  { %2789 = vmatpush3.bf16.msra.mxu0 %v2788_v41  ;;  %2821 = vmatpush3.bf16.msra.mxu1 %v2820_v7 }
 0x188   :  { %2791 = vmatprep.subr.bf16.mxu0 %v2790_v18  ;;  %2823 = vmatprep.subr.bf16.mxu1 %v2822_v21 }
 0x18b   :  { %2793 = vmatpush3.bf16.msra.mxu0 %v2792_v60  ;;  %2825 = vmatpush3.bf16.msra.mxu1 %v2824_v57 }
 0x18c   :  { %2795 = vmatprep.subr.bf16.mxu0 %v2794_v20  ;;  %2827 = vmatprep.subr.bf16.mxu1 %v2826_v16 }
 0x18f   :  { %2797 = vmatpush3.bf16.msra.mxu0 %v2796_v47  ;;  %2829 = vmatpush3.bf16.msra.mxu1 %v2828_v38 }
 0x190   :  { %2799 = vmatprep.subr.bf16.mxu0 %v2798_v51  ;;  %2831 = vmatprep.subr.bf16.mxu1 %v2830_v27 }
 0x193   :  { %2801 = vmatpush3.bf16.msra.mxu0 %v2800_v62  ;;  %2833 = vmatpush3.bf16.msra.mxu1 %v2832_v19 }
 0x196   :  { %2078 = vmatmul.mubr.f32.vlgmr.msra.gmra.mrb[38].mxu0 %v4171_v56  ;;  %2148 = vmatmul.mubr.f32.vlgmr.msra.gmra.mrb[38].mxu1 %v4174_v36 }
 0x1fa   :  { %v2234_v43 = vpop.f32.mrb[32].mxu0 }
 0x1fb   :  { %v2269_v61 = vpop.f32.mrb[32].mxu1  ;;  %v2235_v35 = vpop.f32.mrb[33].mxu0 }
 0x1fc   :  { %v2270_v49 = vpop.f32.mrb[33].mxu1  ;;  %v2236_v0 = vadd.f32 %v2235_v35, %v2234_v43 }
 0x1fd   :  { %v2271_v39 = vadd.f32 %v2270_v49, %v2269_v61 }
 0x1fe   :  { %v1660_v40 = vadd.f32 %v2236_v0, %v2201_v2 }
 0x200   :  { %v1730_v22 = vadd.f32 %v2271_v39, %v1660_v40 }
 0x223   :  { %v2304_v31 = vpop.f32.mrb[34].mxu0 }
 0x224   :  { %v2339_v12 = vpop.f32.mrb[34].mxu1  ;;  %v2305_v55 = vpop.f32.mrb[35].mxu0 }
 0x225   :  { %v2340_v4 = vpop.f32.mrb[35].mxu1  ;;  %v2306_v5 = vadd.f32 %v2305_v55, %v2304_v31 }
 0x226   :  { %v2341_v56 = vadd.f32 %v2340_v4, %v2339_v12 }
 0x227   :  { %v1800_v8 = vadd.f32 %v2306_v5, %v1730_v22 }
 0x229   :  { %v1870_v36 = vadd.f32 %v2341_v56, %v1800_v8 }
 0x249   :  { %v2374_v6 = vpop.f32.mrb[36].mxu0  ;;  %v2409_v37 = vpop.f32.mrb[36].mxu1 }
 0x24a   :  { %v2375_v45 = vpop.f32.mrb[37].mxu0  ;;  %v2410_v26 = vpop.f32.mrb[37].mxu1 }
 0x24b   :  { %v2376_v9 = vadd.f32 %v2375_v45, %v2374_v6  ;;  %v2411_v54 = vadd.f32 %v2410_v26, %v2409_v37 }
 0x24d   :  { %v1940_v34 = vadd.f32 %v2376_v9, %v1870_v36 }
 0x24f   :  { %v2010_v28 = vadd.f32 %v2411_v54, %v1940_v34 }
 0x269   :  { %v2444_v15 = vpop.f32.mrb[38].mxu0  ;;  %v2479_v3 = vpop.f32.mrb[38].mxu1 }
 0x26a   :  { %v2445_v33 = vpop.f32.mrb[39].mxu0  ;;  %v2480_v46 = vpop.f32.mrb[39].mxu1 }
 0x26b   :  { %v2446_v14 = vadd.f32 %v2445_v33, %v2444_v15  ;;  %v2481_v41 = vadd.f32 %v2480_v46, %v2479_v3 }
 0x26d   :  { %v2080_v7 = vadd.f32 %v2446_v14, %v2010_v28 }
 0x26f   :  { %v2150_v24 = vadd.f32 %v2481_v41, %v2080_v7 }
 0x271   :  { %2153 = vst [vmem:[#allocation5] sm:$0x3] %v2150_v24 }
 0x272   :  { %2872 = shalt.err (!%p2869_p12)
}
 0x273   :  { %s2873_s28 = scalar_lea.hbm %s4201_s5, 32 }
 0x274   :  { %p2874_p13 = scmp.ne.s32.totalorder %s4201_s5, %s2873_s28  ;;  %p2877_p0 = scmp.lt.u32.totalorder %s2873_s28, %s4201_s5 }
 0x276   :  { %p2879_p1 = pnand %p2877_p0, %p2874_p13 }
 0x278   :  { %2882 = shalt.err (!%p2879_p1)
}
 0x279   :  { %2163 = dma.vmem_to_hbm [thread:$0]  %s2161_s24, 32, %s4201_s5, [#allocation4]  }
 0x27a   :  { %2885 = dma.done.wait [#allocation4], 32  }
 0x27b   :  { %2886 = vsyncadd [#allocation4], 4294967264 }
 0x27c   :  { %2167 = vsyncpa [#allocation3], 1 }
 0x27d   :  { %2168 = vsyncpa [#allocation4], 1 }

</bundles_post_ra>
